<compile_context>
chip_gen: v6e
topology: v6e:2x2x1
jax: 0.10.0
libtpu: 0.0.40
codegen_flags: <defaults>
</compile_context>

<pallas_src>
import functools

import jax
import jax.numpy as jnp
import numpy as np
from jax.experimental import pallas as pl
from jax.experimental.pallas import tpu as pltpu

# Make every matmul (host prep, reference, and in-kernel defaults) full f32.
jax.config.update("jax_default_matmul_precision", "highest")

K = 7  # number of nearest neighbours (as in SMPLKNN.__init__)


def _smpl_knn_kernel(xyzh_ref, verts_ref, a_aug_t_ref, quat_ref, normal_ref,
                     t16_ref, xbar_ref, rot_ref, nrm_ref):
    xyzh = xyzh_ref[...]                    # (4, TN): rows [x; y; z; 1]
    verts = verts_ref[...]                  # (V, 3)
    TN = xyzh.shape[1]
    V = verts.shape[0]

    xr = xyzh[0:1, :]
    yr = xyzh[1:2, :]
    zr = xyzh[2:3, :]

    # Exact squared distance (same formula as the reference): (V,TN) via
    # lane-broadcast of (V,1) vert coords against (1,TN) point coords.
    dx = verts[:, 0:1] - xr
    dy = verts[:, 1:2] - yr
    dz = verts[:, 2:3] - zr
    D = dx * dx + dy * dy + dz * dz          # (V, TN), exact f32

    # Iterative K-NN selection. The picked confidences are scattered into a dense
    # (V, TN) matrix so the skinning-weight/bone gather becomes one MXU matmul.
    # NOTE: exact distance ties pick all tied verts in one step (vanishingly rare
    # for real point clouds; reference top_k breaks ties by lowest index).
    conf_dense = jnp.zeros((V, TN), jnp.float32)
    for _ in range(K):
        dmin = jnp.min(D, axis=0, keepdims=True)                       # (1, TN)
        picked = D <= dmin                                             # (V, TN) bool
        conf = jnp.exp(-jnp.minimum(dmin, 4.0))                        # clamp(max=4)
        conf_dense = jnp.where(picked, conf, conf_dense)               # scatter conf
        D = jnp.where(picked, jnp.float32(1e30), D)                    # mask out picked

    # (skin @ bones)^T augmented with a ones row: rows 0..15 give the unnormalized
    # forward transform, row 16 gives conf_sum -- all from one MXU matmul.
    # Full-precision (multi-pass) matmul: conf_dense has K=7 nonzeros per column.
    out17 = jnp.dot(a_aug_t_ref[...], conf_dense,
                    preferred_element_type=jnp.float32,
                    precision=jax.lax.Precision.HIGHEST)               # (17, TN)
    inv_sum = 1.0 / out17[16:17, :]                                    # (1, TN) exact
    T16 = out17[0:16, :] * inv_sum                                     # (16, TN)
    t16_ref[...] = T16

    def t(i, k):                                                       # T_fwd[i, k]
        c = 4 * i + k
        return T16[c:c + 1, :]                                         # (1, TN)

    # x_bar = (T_fwd @ [x, y, z, 1])[:3]
    xbar_ref[...] = jnp.concatenate(
        [t(i, 0) * xr + t(i, 1) * yr + t(i, 2) * zr + t(i, 3) for i in range(3)],
        axis=0)                                                        # (3, TN)

    # build_rotation(quaternion), then R_bar = T_fwd[:3,:3] @ R_hat
    q = quat_ref[...]                                                  # (4, TN)
    qr = q[0:1, :]; qx = q[1:2, :]; qy = q[2:3, :]; qz = q[3:4, :]
    inv_norm = 1.0 / jnp.sqrt(qr * qr + qx * qx + qy * qy + qz * qz)   # exact
    qr = qr * inv_norm; qx = qx * inv_norm; qy = qy * inv_norm; qz = qz * inv_norm
    R = [  # row-major R_hat[3*k + j], each (1, TN)
        1.0 - 2.0 * (qy * qy + qz * qz), 2.0 * (qx * qy - qr * qz), 2.0 * (qx * qz + qr * qy),
        2.0 * (qx * qy + qr * qz), 1.0 - 2.0 * (qx * qx + qz * qz), 2.0 * (qy * qz - qr * qx),
        2.0 * (qx * qz - qr * qy), 2.0 * (qy * qz + qr * qx), 1.0 - 2.0 * (qx * qx + qy * qy),
    ]
    rot_ref[...] = jnp.concatenate(
        [t(i, 0) * R[0 * 3 + j] + t(i, 1) * R[1 * 3 + j] + t(i, 2) * R[2 * 3 + j]
         for i in range(3) for j in range(3)], axis=0)                 # (9, TN)

    # n_bar = T_fwd[:3,:3] @ n  (3dgs branch)
    nrm = normal_ref[...]                                              # (3, TN)
    nx = nrm[0:1, :]; ny = nrm[1:2, :]; nz = nrm[2:3, :]
    nrm_ref[...] = jnp.concatenate(
        [t(i, 0) * nx + t(i, 1) * ny + t(i, 2) * nz for i in range(3)], axis=0)


@functools.partial(jax.jit, static_argnames=("tile_n",))
def smpl_knn_forward(xyz, smpl_verts, skinning_weights, bone_transforms, quat, normal,
                     tile_n=128):
    """Returns (T_fwd (N,4,4), x_bar (N,3), rotation_bar (N,3,3), normal_bar (N,3)).

    tile_n=128 is safe for v7x (64 MiB VMEM); at real SMPL size (V~6890) it can be
    raised to 256-512 on v5e/v6e (128 MiB VMEM; bump vmem_limit_bytes accordingly).
    """
    n_pts = xyz.shape[0]
    V = smpl_verts.shape[0]
    J = skinning_weights.shape[1]

    xyz = xyz.astype(jnp.float32)
    quat = quat.astype(jnp.float32)
    normal = normal.astype(jnp.float32)

    # Ragged tail: pad N up to a multiple of the tile, slice outputs afterwards.
    if n_pts % tile_n != 0:
        n_pad = tile_n - n_pts % tile_n
        xyz = jnp.pad(xyz, ((0, n_pad), (0, 0)))
        normal = jnp.pad(normal, ((0, n_pad), (0, 0)))
        quat = jnp.pad(quat, ((0, n_pad), (0, 0)), constant_values=1.0)  # avoid /0
    n_total = xyz.shape[0]

    verts = smpl_verts.astype(jnp.float32)                                             # (V, 3)
    skin = skinning_weights.astype(jnp.float32)
    bones16 = bone_transforms.reshape(J, 16).astype(jnp.float32)

    # Host-side (XLA) prep: tiny matmuls/transposes, keeps the kernel lean.
    xyz_aug_t = jnp.concatenate([xyz.T, jnp.ones((1, n_total), jnp.float32)], axis=0)  # (4, N)
    A_t = jnp.matmul(skin, bones16, precision=jax.lax.Precision.HIGHEST).T             # (16, V)
    A_aug_t = jnp.concatenate([A_t, jnp.ones((1, V), jnp.float32)], axis=0)            # (17, V)
    quat_t = quat.T                                                                    # (4, N)
    normal_t = normal.T                                                                # (3, N)

    grid = (n_total // tile_n,)
    row_spec = lambda r: pl.BlockSpec((r, tile_n), lambda i: (0, i))
    full_spec = lambda shape: pl.BlockSpec(shape, lambda i: (0, 0))

    t16_t, xbar_t, rot_t, nbar_t = pl.pallas_call(
        _smpl_knn_kernel,
        out_shape=(
            jax.ShapeDtypeStruct((16, n_total), jnp.float32),
            jax.ShapeDtypeStruct((3, n_total), jnp.float32),
            jax.ShapeDtypeStruct((9, n_total), jnp.float32),
            jax.ShapeDtypeStruct((3, n_total), jnp.float32),
        ),
        grid_spec=pltpu.PrefetchScalarGridSpec(
            num_scalar_prefetch=0,
            grid=grid,
            in_specs=[
                row_spec(4),             # xyz_aug_t  (4, N)
                full_spec((V, 3)),       # smpl verts (V, 3)
                full_spec((17, V)),      # (skin@bones)^T + ones row  (17, V)
                row_spec(4),             # quat_t     (4, N)
                row_spec(3),             # normal_t   (3, N)
            ],
            out_specs=[row_spec(16), row_spec(3), row_spec(9), row_spec(3)],
        ),
        compiler_params=pltpu.CompilerParams(dimension_semantics=("parallel",)),
        # For real SMPL sizes (V~6890), consider vmem_limit_bytes=... if the
        # (V, tile_n) temporaries exceed the default scoped VMEM limit.
    )(xyz_aug_t, verts, A_aug_t, quat_t, normal_t)

    T_fwd = t16_t[:, :n_pts].T.reshape(n_pts, 4, 4)
    x_bar = xbar_t[:, :n_pts].T
    rot_bar = rot_t[:, :n_pts].T.reshape(n_pts, 3, 3)
    n_bar = nbar_t[:, :n_pts].T
    return T_fwd, x_bar, rot_bar, n_bar


def _reference(xyz, smpl_verts, skinning_weights, bone_transforms, quat, normal):
    n_pts = xyz.shape[0]
    D = jnp.sum((xyz[:, None, :] - smpl_verts[None, :, :]) ** 2, axis=-1)
    neg_d, idx = jax.lax.top_k(-D, K)
    dists = jnp.minimum(-neg_d, 4.0)
    conf = jnp.exp(-dists)
    conf = conf / jnp.sum(conf, axis=-1, keepdims=True)
    w = skinning_weights[idx]                                # (N, K, J)
    pts_W = jnp.sum(w * conf[..., None], axis=1)             # (N, J)
    T16 = pts_W @ bone_transforms.reshape(-1, 16)
    T = T16.reshape(n_pts, 4, 4)
    homo = jnp.concatenate([xyz, jnp.ones((n_pts, 1), jnp.float32)], axis=-1)
    x_bar = jnp.einsum("nij,nj->ni", T, homo)[:, :3]
    q = quat / jnp.linalg.norm(quat, axis=-1, keepdims=True)
    r, x, y, z = q[:, 0], q[:, 1], q[:, 2], q[:, 3]
    R = jnp.stack([
        1 - 2 * (y * y + z * z), 2 * (x * y - r * z), 2 * (x * z + r * y),
        2 * (x * y + r * z), 1 - 2 * (x * x + z * z), 2 * (y * z - r * x),
        2 * (x * z - r * y), 2 * (y * z + r * x), 1 - 2 * (x * x + y * y),
    ], axis=-1).reshape(n_pts, 3, 3)
    rot_bar = jnp.einsum("nij,njk->nik", T[:, :3, :3], R)
    n_bar = jnp.einsum("nij,nj->ni", T[:, :3, :3], normal)
    return T, x_bar, rot_bar, n_bar


if __name__ == "__main__":
    key = jax.random.PRNGKey(0)
    k1, k2, k3, k4, k5, k6 = jax.random.split(key, 6)

    N, V, J = 256, 128, 24  # points, SMPL verts (synthetic), joints

    xyz = jax.random.normal(k1, (N, 3), jnp.float32)
    smpl_verts = jax.random.normal(k2, (V, 3), jnp.float32)
    skin_logits = jax.random.normal(k3, (V, J), jnp.float32)
    skinning_weights = jax.nn.softmax(skin_logits, axis=-1)     # rows sum to 1, like SMPL
    bone_transforms = jax.random.normal(k4, (J, 4, 4), jnp.float32) * 0.1 + \
        jnp.broadcast_to(jnp.eye(4, dtype=jnp.float32), (J, 4, 4))
    quat = jax.random.normal(k5, (N, 4), jnp.float32)
    normal = jax.random.normal(k6, (N, 3), jnp.float32)

    T_fwd, x_bar, rot_bar, n_bar = smpl_knn_forward(
        xyz, smpl_verts, skinning_weights, bone_transforms, quat, normal)
    jax.block_until_ready((T_fwd, x_bar, rot_bar, n_bar))

    T_r, x_r, rot_r, n_r = _reference(
        xyz, smpl_verts, skinning_weights, bone_transforms, quat, normal)

    np.testing.assert_allclose(np.asarray(T_fwd), np.asarray(T_r), rtol=1e-3, atol=1e-3)
    np.testing.assert_allclose(np.asarray(x_bar), np.asarray(x_r), rtol=1e-3, atol=1e-3)
    np.testing.assert_allclose(np.asarray(rot_bar), np.asarray(rot_r), rtol=1e-3, atol=1e-3)
    np.testing.assert_allclose(np.asarray(n_bar), np.asarray(n_r), rtol=1e-3, atol=1e-3)

    # TODO(synk): `deformed_gaussians = gaussians.clone()` / set_fwd_transform attribute
    # plumbing and the 2dgs matrix_to_quaternion branch are host-side bookkeeping with no
    # kernel equivalent; only the numeric forward pass (3dgs branch) is computed.
    print("KERNEL_OK")
</pallas_src>

<mosaic_0001>
module attributes {stable_mosaic.version = 11 : i64} {
  func.func @_smpl_knn_kernel(%arg0: i32, %arg1: memref<4x128xf32, #tpu.memory_space<vmem>>, %arg2: memref<128x3xf32, #tpu.memory_space<vmem>>, %arg3: memref<17x128xf32, #tpu.memory_space<vmem>>, %arg4: memref<4x128xf32, #tpu.memory_space<vmem>>, %arg5: memref<3x128xf32, #tpu.memory_space<vmem>>, %arg6: memref<16x128xf32, #tpu.memory_space<vmem>>, %arg7: memref<3x128xf32, #tpu.memory_space<vmem>>, %arg8: memref<9x128xf32, #tpu.memory_space<vmem>>, %arg9: memref<3x128xf32, #tpu.memory_space<vmem>>) attributes {dimension_semantics = [#tpu.dimension_semantics<parallel>], iteration_bounds = array<i64: 2>, scalar_prefetch = 0 : i64, scratch_operands = 0 : i64, tpu.core_type = #tpu.core_type<tc>, window_params = [{transform_indices = @transform_0, window_bounds = array<i64: 4, 128>}, {pipeline_mode = #tpu.pipeline_mode<synchronous>, transform_indices = @transform_1, window_bounds = array<i64: 128, 3>}, {pipeline_mode = #tpu.pipeline_mode<synchronous>, transform_indices = @transform_2, window_bounds = array<i64: 17, 128>}, {transform_indices = @transform_3, window_bounds = array<i64: 4, 128>}, {transform_indices = @transform_4, window_bounds = array<i64: 3, 128>}, {transform_indices = @transform_5, window_bounds = array<i64: 16, 128>}, {transform_indices = @transform_6, window_bounds = array<i64: 3, 128>}, {transform_indices = @transform_7, window_bounds = array<i64: 9, 128>}, {transform_indices = @transform_8, window_bounds = array<i64: 3, 128>}]} {
    %c0 = arith.constant 0 : index
    %c0_0 = arith.constant 0 : index
    %0 = vector.load %arg1[%c0, %c0_0] : memref<4x128xf32, #tpu.memory_space<vmem>>, vector<4x128xf32>
    %c0_1 = arith.constant 0 : index
    %c0_2 = arith.constant 0 : index
    %1 = vector.load %arg2[%c0_1, %c0_2] : memref<128x3xf32, #tpu.memory_space<vmem>>, vector<128x3xf32>
    %2 = vector.extract_strided_slice %0 {offsets = [0, 0], sizes = [1, 128], strides = [1, 1]} : vector<4x128xf32> to vector<1x128xf32>
    %3 = vector.extract_strided_slice %0 {offsets = [1, 0], sizes = [1, 128], strides = [1, 1]} : vector<4x128xf32> to vector<1x128xf32>
    %4 = vector.extract_strided_slice %0 {offsets = [2, 0], sizes = [1, 128], strides = [1, 1]} : vector<4x128xf32> to vector<1x128xf32>
    %5 = vector.extract_strided_slice %1 {offsets = [0, 0], sizes = [128, 1], strides = [1, 1]} : vector<128x3xf32> to vector<128x1xf32>
    %6 = vector.broadcast %5 : vector<128x1xf32> to vector<128x128xf32>
    %7 = vector.broadcast %2 : vector<1x128xf32> to vector<128x128xf32>
    %8 = arith.subf %6, %7 : vector<128x128xf32>
    %9 = vector.extract_strided_slice %1 {offsets = [0, 1], sizes = [128, 1], strides = [1, 1]} : vector<128x3xf32> to vector<128x1xf32>
    %10 = vector.broadcast %9 : vector<128x1xf32> to vector<128x128xf32>
    %11 = vector.broadcast %3 : vector<1x128xf32> to vector<128x128xf32>
    %12 = arith.subf %10, %11 : vector<128x128xf32>
    %13 = vector.extract_strided_slice %1 {offsets = [0, 2], sizes = [128, 1], strides = [1, 1]} : vector<128x3xf32> to vector<128x1xf32>
    %14 = vector.broadcast %13 : vector<128x1xf32> to vector<128x128xf32>
    %15 = vector.broadcast %4 : vector<1x128xf32> to vector<128x128xf32>
    %16 = arith.subf %14, %15 : vector<128x128xf32>
    %17 = arith.mulf %8, %8 : vector<128x128xf32>
    %18 = arith.mulf %12, %12 : vector<128x128xf32>
    %19 = arith.addf %17, %18 : vector<128x128xf32>
    %20 = arith.mulf %16, %16 : vector<128x128xf32>
    %21 = arith.addf %19, %20 : vector<128x128xf32>
    %cst = arith.constant 0.000000e+00 : f32
    %22 = vector.broadcast %cst : f32 to vector<128x128xf32>
    %cst_3 = arith.constant dense<0x7F800000> : vector<128xf32>
    %23 = vector.multi_reduction <minimumf>, %21, %cst_3 [0] : vector<128x128xf32> to vector<128xf32>
    %24 = vector.shape_cast %23 : vector<128xf32> to vector<1x128xf32>
    %25 = vector.broadcast %24 : vector<1x128xf32> to vector<128x128xf32>
    %26 = arith.cmpf ole, %21, %25 : vector<128x128xf32>
    %cst_4 = arith.constant 4.000000e+00 : f32
    %27 = vector.broadcast %cst_4 : f32 to vector<1x128xf32>
    %28 = arith.minimumf %24, %27 : vector<1x128xf32>
    %cst_5 = arith.constant 0.000000e+00 : f32
    %29 = vector.broadcast %cst_5 : f32 to vector<1x128xf32>
    %30 = arith.subf %29, %28 : vector<1x128xf32>
    %31 = math.exp %30 : vector<1x128xf32>
    %32 = vector.shape_cast %31 : vector<1x128xf32> to vector<1x128xf32>
    %33 = vector.broadcast %32 : vector<1x128xf32> to vector<128x128xf32>
    %34 = arith.select %26, %33, %22 : vector<128x128xi1>, vector<128x128xf32>
    %cst_6 = arith.constant 1.000000e+30 : f32
    %35 = vector.broadcast %cst_6 : f32 to vector<128x128xf32>
    %36 = arith.select %26, %35, %21 : vector<128x128xi1>, vector<128x128xf32>
    %cst_7 = arith.constant dense<0x7F800000> : vector<128xf32>
    %37 = vector.multi_reduction <minimumf>, %36, %cst_7 [0] : vector<128x128xf32> to vector<128xf32>
    %38 = vector.shape_cast %37 : vector<128xf32> to vector<1x128xf32>
    %39 = vector.broadcast %38 : vector<1x128xf32> to vector<128x128xf32>
    %40 = arith.cmpf ole, %36, %39 : vector<128x128xf32>
    %cst_8 = arith.constant 4.000000e+00 : f32
    %41 = vector.broadcast %cst_8 : f32 to vector<1x128xf32>
    %42 = arith.minimumf %38, %41 : vector<1x128xf32>
    %cst_9 = arith.constant 0.000000e+00 : f32
    %43 = vector.broadcast %cst_9 : f32 to vector<1x128xf32>
    %44 = arith.subf %43, %42 : vector<1x128xf32>
    %45 = math.exp %44 : vector<1x128xf32>
    %46 = vector.shape_cast %45 : vector<1x128xf32> to vector<1x128xf32>
    %47 = vector.broadcast %46 : vector<1x128xf32> to vector<128x128xf32>
    %48 = arith.select %40, %47, %34 : vector<128x128xi1>, vector<128x128xf32>
    %cst_10 = arith.constant 1.000000e+30 : f32
    %49 = vector.broadcast %cst_10 : f32 to vector<128x128xf32>
    %50 = arith.select %40, %49, %36 : vector<128x128xi1>, vector<128x128xf32>
    %cst_11 = arith.constant dense<0x7F800000> : vector<128xf32>
    %51 = vector.multi_reduction <minimumf>, %50, %cst_11 [0] : vector<128x128xf32> to vector<128xf32>
    %52 = vector.shape_cast %51 : vector<128xf32> to vector<1x128xf32>
    %53 = vector.broadcast %52 : vector<1x128xf32> to vector<128x128xf32>
    %54 = arith.cmpf ole, %50, %53 : vector<128x128xf32>
    %cst_12 = arith.constant 4.000000e+00 : f32
    %55 = vector.broadcast %cst_12 : f32 to vector<1x128xf32>
    %56 = arith.minimumf %52, %55 : vector<1x128xf32>
    %cst_13 = arith.constant 0.000000e+00 : f32
    %57 = vector.broadcast %cst_13 : f32 to vector<1x128xf32>
    %58 = arith.subf %57, %56 : vector<1x128xf32>
    %59 = math.exp %58 : vector<1x128xf32>
    %60 = vector.shape_cast %59 : vector<1x128xf32> to vector<1x128xf32>
    %61 = vector.broadcast %60 : vector<1x128xf32> to vector<128x128xf32>
    %62 = arith.select %54, %61, %48 : vector<128x128xi1>, vector<128x128xf32>
    %cst_14 = arith.constant 1.000000e+30 : f32
    %63 = vector.broadcast %cst_14 : f32 to vector<128x128xf32>
    %64 = arith.select %54, %63, %50 : vector<128x128xi1>, vector<128x128xf32>
    %cst_15 = arith.constant dense<0x7F800000> : vector<128xf32>
    %65 = vector.multi_reduction <minimumf>, %64, %cst_15 [0] : vector<128x128xf32> to vector<128xf32>
    %66 = vector.shape_cast %65 : vector<128xf32> to vector<1x128xf32>
    %67 = vector.broadcast %66 : vector<1x128xf32> to vector<128x128xf32>
    %68 = arith.cmpf ole, %64, %67 : vector<128x128xf32>
    %cst_16 = arith.constant 4.000000e+00 : f32
    %69 = vector.broadcast %cst_16 : f32 to vector<1x128xf32>
    %70 = arith.minimumf %66, %69 : vector<1x128xf32>
    %cst_17 = arith.constant 0.000000e+00 : f32
    %71 = vector.broadcast %cst_17 : f32 to vector<1x128xf32>
    %72 = arith.subf %71, %70 : vector<1x128xf32>
    %73 = math.exp %72 : vector<1x128xf32>
    %74 = vector.shape_cast %73 : vector<1x128xf32> to vector<1x128xf32>
    %75 = vector.broadcast %74 : vector<1x128xf32> to vector<128x128xf32>
    %76 = arith.select %68, %75, %62 : vector<128x128xi1>, vector<128x128xf32>
    %cst_18 = arith.constant 1.000000e+30 : f32
    %77 = vector.broadcast %cst_18 : f32 to vector<128x128xf32>
    %78 = arith.select %68, %77, %64 : vector<128x128xi1>, vector<128x128xf32>
    %cst_19 = arith.constant dense<0x7F800000> : vector<128xf32>
    %79 = vector.multi_reduction <minimumf>, %78, %cst_19 [0] : vector<128x128xf32> to vector<128xf32>
    %80 = vector.shape_cast %79 : vector<128xf32> to vector<1x128xf32>
    %81 = vector.broadcast %80 : vector<1x128xf32> to vector<128x128xf32>
    %82 = arith.cmpf ole, %78, %81 : vector<128x128xf32>
    %cst_20 = arith.constant 4.000000e+00 : f32
    %83 = vector.broadcast %cst_20 : f32 to vector<1x128xf32>
    %84 = arith.minimumf %80, %83 : vector<1x128xf32>
    %cst_21 = arith.constant 0.000000e+00 : f32
    %85 = vector.broadcast %cst_21 : f32 to vector<1x128xf32>
    %86 = arith.subf %85, %84 : vector<1x128xf32>
    %87 = math.exp %86 : vector<1x128xf32>
    %88 = vector.shape_cast %87 : vector<1x128xf32> to vector<1x128xf32>
    %89 = vector.broadcast %88 : vector<1x128xf32> to vector<128x128xf32>
    %90 = arith.select %82, %89, %76 : vector<128x128xi1>, vector<128x128xf32>
    %cst_22 = arith.constant 1.000000e+30 : f32
    %91 = vector.broadcast %cst_22 : f32 to vector<128x128xf32>
    %92 = arith.select %82, %91, %78 : vector<128x128xi1>, vector<128x128xf32>
    %cst_23 = arith.constant dense<0x7F800000> : vector<128xf32>
    %93 = vector.multi_reduction <minimumf>, %92, %cst_23 [0] : vector<128x128xf32> to vector<128xf32>
    %94 = vector.shape_cast %93 : vector<128xf32> to vector<1x128xf32>
    %95 = vector.broadcast %94 : vector<1x128xf32> to vector<128x128xf32>
    %96 = arith.cmpf ole, %92, %95 : vector<128x128xf32>
    %cst_24 = arith.constant 4.000000e+00 : f32
    %97 = vector.broadcast %cst_24 : f32 to vector<1x128xf32>
    %98 = arith.minimumf %94, %97 : vector<1x128xf32>
    %cst_25 = arith.constant 0.000000e+00 : f32
    %99 = vector.broadcast %cst_25 : f32 to vector<1x128xf32>
    %100 = arith.subf %99, %98 : vector<1x128xf32>
    %101 = math.exp %100 : vector<1x128xf32>
    %102 = vector.shape_cast %101 : vector<1x128xf32> to vector<1x128xf32>
    %103 = vector.broadcast %102 : vector<1x128xf32> to vector<128x128xf32>
    %104 = arith.select %96, %103, %90 : vector<128x128xi1>, vector<128x128xf32>
    %cst_26 = arith.constant 1.000000e+30 : f32
    %105 = vector.broadcast %cst_26 : f32 to vector<128x128xf32>
    %106 = arith.select %96, %105, %92 : vector<128x128xi1>, vector<128x128xf32>
    %cst_27 = arith.constant dense<0x7F800000> : vector<128xf32>
    %107 = vector.multi_reduction <minimumf>, %106, %cst_27 [0] : vector<128x128xf32> to vector<128xf32>
    %108 = vector.shape_cast %107 : vector<128xf32> to vector<1x128xf32>
    %109 = vector.broadcast %108 : vector<1x128xf32> to vector<128x128xf32>
    %110 = arith.cmpf ole, %106, %109 : vector<128x128xf32>
    %cst_28 = arith.constant 4.000000e+00 : f32
    %111 = vector.broadcast %cst_28 : f32 to vector<1x128xf32>
    %112 = arith.minimumf %108, %111 : vector<1x128xf32>
    %cst_29 = arith.constant 0.000000e+00 : f32
    %113 = vector.broadcast %cst_29 : f32 to vector<1x128xf32>
    %114 = arith.subf %113, %112 : vector<1x128xf32>
    %115 = math.exp %114 : vector<1x128xf32>
    %116 = vector.shape_cast %115 : vector<1x128xf32> to vector<1x128xf32>
    %117 = vector.broadcast %116 : vector<1x128xf32> to vector<128x128xf32>
    %118 = arith.select %110, %117, %104 : vector<128x128xi1>, vector<128x128xf32>
    %c0_30 = arith.constant 0 : index
    %c0_31 = arith.constant 0 : index
    %119 = vector.load %arg3[%c0_30, %c0_31] : memref<17x128xf32, #tpu.memory_space<vmem>>, vector<17x128xf32>
    %cst_32 = arith.constant dense<0.000000e+00> : vector<17x128xf32>
    %120 = tpu.matmul %119, %118, %cst_32 {dimension_numbers = #tpu.dot_dimension_numbers<[1], [0], [0], [1], [0, 0, 1, 1], [], []>, precision = #tpu.contract_precision<fp32>} : vector<17x128xf32>, vector<128x128xf32>, vector<17x128xf32> -> vector<17x128xf32>
    %121 = vector.extract_strided_slice %120 {offsets = [16, 0], sizes = [1, 128], strides = [1, 1]} : vector<17x128xf32> to vector<1x128xf32>
    %cst_33 = arith.constant 1.000000e+00 : f32
    %122 = vector.broadcast %cst_33 : f32 to vector<1x128xf32>
    %123 = arith.divf %122, %121 : vector<1x128xf32>
    %124 = vector.extract_strided_slice %120 {offsets = [0, 0], sizes = [16, 128], strides = [1, 1]} : vector<17x128xf32> to vector<16x128xf32>
    %125 = vector.broadcast %123 : vector<1x128xf32> to vector<16x128xf32>
    %126 = arith.mulf %124, %125 : vector<16x128xf32>
    %c0_34 = arith.constant 0 : index
    %c0_35 = arith.constant 0 : index
    %127 = vector.load %arg6[%c0_34, %c0_35] : memref<16x128xf32, #tpu.memory_space<vmem>>, vector<16x128xf32>
    tpu.vector_store %arg6[%c0_34, %c0_35], %126 {strides = array<i32>} : memref<16x128xf32, #tpu.memory_space<vmem>>, vector<16x128xf32>,
    %128 = vector.extract_strided_slice %126 {offsets = [0, 0], sizes = [1, 128], strides = [1, 1]} : vector<16x128xf32> to vector<1x128xf32>
    %129 = arith.mulf %128, %2 : vector<1x128xf32>
    %130 = vector.extract_strided_slice %126 {offsets = [1, 0], sizes = [1, 128], strides = [1, 1]} : vector<16x128xf32> to vector<1x128xf32>
    %131 = arith.mulf %130, %3 : vector<1x128xf32>
    %132 = arith.addf %129, %131 : vector<1x128xf32>
    %133 = vector.extract_strided_slice %126 {offsets = [2, 0], sizes = [1, 128], strides = [1, 1]} : vector<16x128xf32> to vector<1x128xf32>
    %134 = arith.mulf %133, %4 : vector<1x128xf32>
    %135 = arith.addf %132, %134 : vector<1x128xf32>
    %136 = vector.extract_strided_slice %126 {offsets = [3, 0], sizes = [1, 128], strides = [1, 1]} : vector<16x128xf32> to vector<1x128xf32>
    %137 = arith.addf %135, %136 : vector<1x128xf32>
    %138 = vector.extract_strided_slice %126 {offsets = [4, 0], sizes = [1, 128], strides = [1, 1]} : vector<16x128xf32> to vector<1x128xf32>
    %139 = arith.mulf %138, %2 : vector<1x128xf32>
    %140 = vector.extract_strided_slice %126 {offsets = [5, 0], sizes = [1, 128], strides = [1, 1]} : vector<16x128xf32> to vector<1x128xf32>
    %141 = arith.mulf %140, %3 : vector<1x128xf32>
    %142 = arith.addf %139, %141 : vector<1x128xf32>
    %143 = vector.extract_strided_slice %126 {offsets = [6, 0], sizes = [1, 128], strides = [1, 1]} : vector<16x128xf32> to vector<1x128xf32>
    %144 = arith.mulf %143, %4 : vector<1x128xf32>
    %145 = arith.addf %142, %144 : vector<1x128xf32>
    %146 = vector.extract_strided_slice %126 {offsets = [7, 0], sizes = [1, 128], strides = [1, 1]} : vector<16x128xf32> to vector<1x128xf32>
    %147 = arith.addf %145, %146 : vector<1x128xf32>
    %148 = vector.extract_strided_slice %126 {offsets = [8, 0], sizes = [1, 128], strides = [1, 1]} : vector<16x128xf32> to vector<1x128xf32>
    %149 = arith.mulf %148, %2 : vector<1x128xf32>
    %150 = vector.extract_strided_slice %126 {offsets = [9, 0], sizes = [1, 128], strides = [1, 1]} : vector<16x128xf32> to vector<1x128xf32>
    %151 = arith.mulf %150, %3 : vector<1x128xf32>
    %152 = arith.addf %149, %151 : vector<1x128xf32>
    %153 = vector.extract_strided_slice %126 {offsets = [10, 0], sizes = [1, 128], strides = [1, 1]} : vector<16x128xf32> to vector<1x128xf32>
    %154 = arith.mulf %153, %4 : vector<1x128xf32>
    %155 = arith.addf %152, %154 : vector<1x128xf32>
    %156 = vector.extract_strided_slice %126 {offsets = [11, 0], sizes = [1, 128], strides = [1, 1]} : vector<16x128xf32> to vector<1x128xf32>
    %157 = arith.addf %155, %156 : vector<1x128xf32>
    %158 = tpu.concatenate %137, %147, %157 in 0 : vector<1x128xf32>, vector<1x128xf32>, vector<1x128xf32> -> vector<3x128xf32>
    %c0_36 = arith.constant 0 : index
    %c0_37 = arith.constant 0 : index
    %159 = vector.load %arg7[%c0_36, %c0_37] : memref<3x128xf32, #tpu.memory_space<vmem>>, vector<3x128xf32>
    tpu.vector_store %arg7[%c0_36, %c0_37], %158 {strides = array<i32>} : memref<3x128xf32, #tpu.memory_space<vmem>>, vector<3x128xf32>,
    %c0_38 = arith.constant 0 : index
    %c0_39 = arith.constant 0 : index
    %160 = vector.load %arg4[%c0_38, %c0_39] : memref<4x128xf32, #tpu.memory_space<vmem>>, vector<4x128xf32>
    %161 = vector.extract_strided_slice %160 {offsets = [0, 0], sizes = [1, 128], strides = [1, 1]} : vector<4x128xf32> to vector<1x128xf32>
    %162 = vector.extract_strided_slice %160 {offsets = [1, 0], sizes = [1, 128], strides = [1, 1]} : vector<4x128xf32> to vector<1x128xf32>
    %163 = vector.extract_strided_slice %160 {offsets = [2, 0], sizes = [1, 128], strides = [1, 1]} : vector<4x128xf32> to vector<1x128xf32>
    %164 = vector.extract_strided_slice %160 {offsets = [3, 0], sizes = [1, 128], strides = [1, 1]} : vector<4x128xf32> to vector<1x128xf32>
    %165 = arith.mulf %161, %161 : vector<1x128xf32>
    %166 = arith.mulf %162, %162 : vector<1x128xf32>
    %167 = arith.addf %165, %166 : vector<1x128xf32>
    %168 = arith.mulf %163, %163 : vector<1x128xf32>
    %169 = arith.addf %167, %168 : vector<1x128xf32>
    %170 = arith.mulf %164, %164 : vector<1x128xf32>
    %171 = arith.addf %169, %170 : vector<1x128xf32>
    %172 = math.sqrt %171 : vector<1x128xf32>
    %cst_40 = arith.constant 1.000000e+00 : f32
    %173 = vector.broadcast %cst_40 : f32 to vector<1x128xf32>
    %174 = arith.divf %173, %172 : vector<1x128xf32>
    %175 = arith.mulf %161, %174 : vector<1x128xf32>
    %176 = arith.mulf %162, %174 : vector<1x128xf32>
    %177 = arith.mulf %163, %174 : vector<1x128xf32>
    %178 = arith.mulf %164, %174 : vector<1x128xf32>
    %179 = arith.mulf %177, %177 : vector<1x128xf32>
    %180 = arith.mulf %178, %178 : vector<1x128xf32>
    %181 = arith.addf %179, %180 : vector<1x128xf32>
    %cst_41 = arith.constant 2.000000e+00 : f32
    %182 = vector.broadcast %cst_41 : f32 to vector<1x128xf32>
    %183 = arith.mulf %182, %181 : vector<1x128xf32>
    %cst_42 = arith.constant 1.000000e+00 : f32
    %184 = vector.broadcast %cst_42 : f32 to vector<1x128xf32>
    %185 = arith.subf %184, %183 : vector<1x128xf32>
    %186 = arith.mulf %176, %177 : vector<1x128xf32>
    %187 = arith.mulf %175, %178 : vector<1x128xf32>
    %188 = arith.subf %186, %187 : vector<1x128xf32>
    %cst_43 = arith.constant 2.000000e+00 : f32
    %189 = vector.broadcast %cst_43 : f32 to vector<1x128xf32>
    %190 = arith.mulf %189, %188 : vector<1x128xf32>
    %191 = arith.mulf %176, %178 : vector<1x128xf32>
    %192 = arith.mulf %175, %177 : vector<1x128xf32>
    %193 = arith.addf %191, %192 : vector<1x128xf32>
    %cst_44 = arith.constant 2.000000e+00 : f32
    %194 = vector.broadcast %cst_44 : f32 to vector<1x128xf32>
    %195 = arith.mulf %194, %193 : vector<1x128xf32>
    %196 = arith.mulf %176, %177 : vector<1x128xf32>
    %197 = arith.mulf %175, %178 : vector<1x128xf32>
    %198 = arith.addf %196, %197 : vector<1x128xf32>
    %cst_45 = arith.constant 2.000000e+00 : f32
    %199 = vector.broadcast %cst_45 : f32 to vector<1x128xf32>
    %200 = arith.mulf %199, %198 : vector<1x128xf32>
    %201 = arith.mulf %176, %176 : vector<1x128xf32>
    %202 = arith.mulf %178, %178 : vector<1x128xf32>
    %203 = arith.addf %201, %202 : vector<1x128xf32>
    %cst_46 = arith.constant 2.000000e+00 : f32
    %204 = vector.broadcast %cst_46 : f32 to vector<1x128xf32>
    %205 = arith.mulf %204, %203 : vector<1x128xf32>
    %cst_47 = arith.constant 1.000000e+00 : f32
    %206 = vector.broadcast %cst_47 : f32 to vector<1x128xf32>
    %207 = arith.subf %206, %205 : vector<1x128xf32>
    %208 = arith.mulf %177, %178 : vector<1x128xf32>
    %209 = arith.mulf %175, %176 : vector<1x128xf32>
    %210 = arith.subf %208, %209 : vector<1x128xf32>
    %cst_48 = arith.constant 2.000000e+00 : f32
    %211 = vector.broadcast %cst_48 : f32 to vector<1x128xf32>
    %212 = arith.mulf %211, %210 : vector<1x128xf32>
    %213 = arith.mulf %176, %178 : vector<1x128xf32>
    %214 = arith.mulf %175, %177 : vector<1x128xf32>
    %215 = arith.subf %213, %214 : vector<1x128xf32>
    %cst_49 = arith.constant 2.000000e+00 : f32
    %216 = vector.broadcast %cst_49 : f32 to vector<1x128xf32>
    %217 = arith.mulf %216, %215 : vector<1x128xf32>
    %218 = arith.mulf %177, %178 : vector<1x128xf32>
    %219 = arith.mulf %175, %176 : vector<1x128xf32>
    %220 = arith.addf %218, %219 : vector<1x128xf32>
    %cst_50 = arith.constant 2.000000e+00 : f32
    %221 = vector.broadcast %cst_50 : f32 to vector<1x128xf32>
    %222 = arith.mulf %221, %220 : vector<1x128xf32>
    %223 = arith.mulf %176, %176 : vector<1x128xf32>
    %224 = arith.mulf %177, %177 : vector<1x128xf32>
    %225 = arith.addf %223, %224 : vector<1x128xf32>
    %cst_51 = arith.constant 2.000000e+00 : f32
    %226 = vector.broadcast %cst_51 : f32 to vector<1x128xf32>
    %227 = arith.mulf %226, %225 : vector<1x128xf32>
    %cst_52 = arith.constant 1.000000e+00 : f32
    %228 = vector.broadcast %cst_52 : f32 to vector<1x128xf32>
    %229 = arith.subf %228, %227 : vector<1x128xf32>
    %230 = vector.extract_strided_slice %126 {offsets = [0, 0], sizes = [1, 128], strides = [1, 1]} : vector<16x128xf32> to vector<1x128xf32>
    %231 = arith.mulf %230, %185 : vector<1x128xf32>
    %232 = vector.extract_strided_slice %126 {offsets = [1, 0], sizes = [1, 128], strides = [1, 1]} : vector<16x128xf32> to vector<1x128xf32>
    %233 = arith.mulf %232, %200 : vector<1x128xf32>
    %234 = arith.addf %231, %233 : vector<1x128xf32>
    %235 = vector.extract_strided_slice %126 {offsets = [2, 0], sizes = [1, 128], strides = [1, 1]} : vector<16x128xf32> to vector<1x128xf32>
    %236 = arith.mulf %235, %217 : vector<1x128xf32>
    %237 = arith.addf %234, %236 : vector<1x128xf32>
    %238 = vector.extract_strided_slice %126 {offsets = [0, 0], sizes = [1, 128], strides = [1, 1]} : vector<16x128xf32> to vector<1x128xf32>
    %239 = arith.mulf %238, %190 : vector<1x128xf32>
    %240 = vector.extract_strided_slice %126 {offsets = [1, 0], sizes = [1, 128], strides = [1, 1]} : vector<16x128xf32> to vector<1x128xf32>
    %241 = arith.mulf %240, %207 : vector<1x128xf32>
    %242 = arith.addf %239, %241 : vector<1x128xf32>
    %243 = vector.extract_strided_slice %126 {offsets = [2, 0], sizes = [1, 128], strides = [1, 1]} : vector<16x128xf32> to vector<1x128xf32>
    %244 = arith.mulf %243, %222 : vector<1x128xf32>
    %245 = arith.addf %242, %244 : vector<1x128xf32>
    %246 = vector.extract_strided_slice %126 {offsets = [0, 0], sizes = [1, 128], strides = [1, 1]} : vector<16x128xf32> to vector<1x128xf32>
    %247 = arith.mulf %246, %195 : vector<1x128xf32>
    %248 = vector.extract_strided_slice %126 {offsets = [1, 0], sizes = [1, 128], strides = [1, 1]} : vector<16x128xf32> to vector<1x128xf32>
    %249 = arith.mulf %248, %212 : vector<1x128xf32>
    %250 = arith.addf %247, %249 : vector<1x128xf32>
    %251 = vector.extract_strided_slice %126 {offsets = [2, 0], sizes = [1, 128], strides = [1, 1]} : vector<16x128xf32> to vector<1x128xf32>
    %252 = arith.mulf %251, %229 : vector<1x128xf32>
    %253 = arith.addf %250, %252 : vector<1x128xf32>
    %254 = vector.extract_strided_slice %126 {offsets = [4, 0], sizes = [1, 128], strides = [1, 1]} : vector<16x128xf32> to vector<1x128xf32>
    %255 = arith.mulf %254, %185 : vector<1x128xf32>
    %256 = vector.extract_strided_slice %126 {offsets = [5, 0], sizes = [1, 128], strides = [1, 1]} : vector<16x128xf32> to vector<1x128xf32>
    %257 = arith.mulf %256, %200 : vector<1x128xf32>
    %258 = arith.addf %255, %257 : vector<1x128xf32>
    %259 = vector.extract_strided_slice %126 {offsets = [6, 0], sizes = [1, 128], strides = [1, 1]} : vector<16x128xf32> to vector<1x128xf32>
    %260 = arith.mulf %259, %217 : vector<1x128xf32>
    %261 = arith.addf %258, %260 : vector<1x128xf32>
    %262 = vector.extract_strided_slice %126 {offsets = [4, 0], sizes = [1, 128], strides = [1, 1]} : vector<16x128xf32> to vector<1x128xf32>
    %263 = arith.mulf %262, %190 : vector<1x128xf32>
    %264 = vector.extract_strided_slice %126 {offsets = [5, 0], sizes = [1, 128], strides = [1, 1]} : vector<16x128xf32> to vector<1x128xf32>
    %265 = arith.mulf %264, %207 : vector<1x128xf32>
    %266 = arith.addf %263, %265 : vector<1x128xf32>
    %267 = vector.extract_strided_slice %126 {offsets = [6, 0], sizes = [1, 128], strides = [1, 1]} : vector<16x128xf32> to vector<1x128xf32>
    %268 = arith.mulf %267, %222 : vector<1x128xf32>
    %269 = arith.addf %266, %268 : vector<1x128xf32>
    %270 = vector.extract_strided_slice %126 {offsets = [4, 0], sizes = [1, 128], strides = [1, 1]} : vector<16x128xf32> to vector<1x128xf32>
    %271 = arith.mulf %270, %195 : vector<1x128xf32>
    %272 = vector.extract_strided_slice %126 {offsets = [5, 0], sizes = [1, 128], strides = [1, 1]} : vector<16x128xf32> to vector<1x128xf32>
    %273 = arith.mulf %272, %212 : vector<1x128xf32>
    %274 = arith.addf %271, %273 : vector<1x128xf32>
    %275 = vector.extract_strided_slice %126 {offsets = [6, 0], sizes = [1, 128], strides = [1, 1]} : vector<16x128xf32> to vector<1x128xf32>
    %276 = arith.mulf %275, %229 : vector<1x128xf32>
    %277 = arith.addf %274, %276 : vector<1x128xf32>
    %278 = vector.extract_strided_slice %126 {offsets = [8, 0], sizes = [1, 128], strides = [1, 1]} : vector<16x128xf32> to vector<1x128xf32>
    %279 = arith.mulf %278, %185 : vector<1x128xf32>
    %280 = vector.extract_strided_slice %126 {offsets = [9, 0], sizes = [1, 128], strides = [1, 1]} : vector<16x128xf32> to vector<1x128xf32>
    %281 = arith.mulf %280, %200 : vector<1x128xf32>
    %282 = arith.addf %279, %281 : vector<1x128xf32>
    %283 = vector.extract_strided_slice %126 {offsets = [10, 0], sizes = [1, 128], strides = [1, 1]} : vector<16x128xf32> to vector<1x128xf32>
    %284 = arith.mulf %283, %217 : vector<1x128xf32>
    %285 = arith.addf %282, %284 : vector<1x128xf32>
    %286 = vector.extract_strided_slice %126 {offsets = [8, 0], sizes = [1, 128], strides = [1, 1]} : vector<16x128xf32> to vector<1x128xf32>
    %287 = arith.mulf %286, %190 : vector<1x128xf32>
    %288 = vector.extract_strided_slice %126 {offsets = [9, 0], sizes = [1, 128], strides = [1, 1]} : vector<16x128xf32> to vector<1x128xf32>
    %289 = arith.mulf %288, %207 : vector<1x128xf32>
    %290 = arith.addf %287, %289 : vector<1x128xf32>
    %291 = vector.extract_strided_slice %126 {offsets = [10, 0], sizes = [1, 128], strides = [1, 1]} : vector<16x128xf32> to vector<1x128xf32>
    %292 = arith.mulf %291, %222 : vector<1x128xf32>
    %293 = arith.addf %290, %292 : vector<1x128xf32>
    %294 = vector.extract_strided_slice %126 {offsets = [8, 0], sizes = [1, 128], strides = [1, 1]} : vector<16x128xf32> to vector<1x128xf32>
    %295 = arith.mulf %294, %195 : vector<1x128xf32>
    %296 = vector.extract_strided_slice %126 {offsets = [9, 0], sizes = [1, 128], strides = [1, 1]} : vector<16x128xf32> to vector<1x128xf32>
    %297 = arith.mulf %296, %212 : vector<1x128xf32>
    %298 = arith.addf %295, %297 : vector<1x128xf32>
    %299 = vector.extract_strided_slice %126 {offsets = [10, 0], sizes = [1, 128], strides = [1, 1]} : vector<16x128xf32> to vector<1x128xf32>
    %300 = arith.mulf %299, %229 : vector<1x128xf32>
    %301 = arith.addf %298, %300 : vector<1x128xf32>
    %302 = tpu.concatenate %237, %245, %253, %261, %269, %277, %285, %293, %301 in 0 : vector<1x128xf32>, vector<1x128xf32>, vector<1x128xf32>, vector<1x128xf32>, vector<1x128xf32>, vector<1x128xf32>, vector<1x128xf32>, vector<1x128xf32>, vector<1x128xf32> -> vector<9x128xf32>
    %c0_53 = arith.constant 0 : index
    %c0_54 = arith.constant 0 : index
    %303 = vector.load %arg8[%c0_53, %c0_54] : memref<9x128xf32, #tpu.memory_space<vmem>>, vector<9x128xf32>
    tpu.vector_store %arg8[%c0_53, %c0_54], %302 {strides = array<i32>} : memref<9x128xf32, #tpu.memory_space<vmem>>, vector<9x128xf32>,
    %c0_55 = arith.constant 0 : index
    %c0_56 = arith.constant 0 : index
    %304 = vector.load %arg5[%c0_55, %c0_56] : memref<3x128xf32, #tpu.memory_space<vmem>>, vector<3x128xf32>
    %305 = vector.extract_strided_slice %304 {offsets = [0, 0], sizes = [1, 128], strides = [1, 1]} : vector<3x128xf32> to vector<1x128xf32>
    %306 = vector.extract_strided_slice %304 {offsets = [1, 0], sizes = [1, 128], strides = [1, 1]} : vector<3x128xf32> to vector<1x128xf32>
    %307 = vector.extract_strided_slice %304 {offsets = [2, 0], sizes = [1, 128], strides = [1, 1]} : vector<3x128xf32> to vector<1x128xf32>
    %308 = vector.extract_strided_slice %126 {offsets = [0, 0], sizes = [1, 128], strides = [1, 1]} : vector<16x128xf32> to vector<1x128xf32>
    %309 = arith.mulf %308, %305 : vector<1x128xf32>
    %310 = vector.extract_strided_slice %126 {offsets = [1, 0], sizes = [1, 128], strides = [1, 1]} : vector<16x128xf32> to vector<1x128xf32>
    %311 = arith.mulf %310, %306 : vector<1x128xf32>
    %312 = arith.addf %309, %311 : vector<1x128xf32>
    %313 = vector.extract_strided_slice %126 {offsets = [2, 0], sizes = [1, 128], strides = [1, 1]} : vector<16x128xf32> to vector<1x128xf32>
    %314 = arith.mulf %313, %307 : vector<1x128xf32>
    %315 = arith.addf %312, %314 : vector<1x128xf32>
    %316 = vector.extract_strided_slice %126 {offsets = [4, 0], sizes = [1, 128], strides = [1, 1]} : vector<16x128xf32> to vector<1x128xf32>
    %317 = arith.mulf %316, %305 : vector<1x128xf32>
    %318 = vector.extract_strided_slice %126 {offsets = [5, 0], sizes = [1, 128], strides = [1, 1]} : vector<16x128xf32> to vector<1x128xf32>
    %319 = arith.mulf %318, %306 : vector<1x128xf32>
    %320 = arith.addf %317, %319 : vector<1x128xf32>
    %321 = vector.extract_strided_slice %126 {offsets = [6, 0], sizes = [1, 128], strides = [1, 1]} : vector<16x128xf32> to vector<1x128xf32>
    %322 = arith.mulf %321, %307 : vector<1x128xf32>
    %323 = arith.addf %320, %322 : vector<1x128xf32>
    %324 = vector.extract_strided_slice %126 {offsets = [8, 0], sizes = [1, 128], strides = [1, 1]} : vector<16x128xf32> to vector<1x128xf32>
    %325 = arith.mulf %324, %305 : vector<1x128xf32>
    %326 = vector.extract_strided_slice %126 {offsets = [9, 0], sizes = [1, 128], strides = [1, 1]} : vector<16x128xf32> to vector<1x128xf32>
    %327 = arith.mulf %326, %306 : vector<1x128xf32>
    %328 = arith.addf %325, %327 : vector<1x128xf32>
    %329 = vector.extract_strided_slice %126 {offsets = [10, 0], sizes = [1, 128], strides = [1, 1]} : vector<16x128xf32> to vector<1x128xf32>
    %330 = arith.mulf %329, %307 : vector<1x128xf32>
    %331 = arith.addf %328, %330 : vector<1x128xf32>
    %332 = tpu.concatenate %315, %323, %331 in 0 : vector<1x128xf32>, vector<1x128xf32>, vector<1x128xf32> -> vector<3x128xf32>
    %c0_57 = arith.constant 0 : index
    %c0_58 = arith.constant 0 : index
    %333 = vector.load %arg9[%c0_57, %c0_58] : memref<3x128xf32, #tpu.memory_space<vmem>>, vector<3x128xf32>
    tpu.vector_store %arg9[%c0_57, %c0_58], %332 {strides = array<i32>} : memref<3x128xf32, #tpu.memory_space<vmem>>, vector<3x128xf32>,
    return
  }
  func.func @transform_0(%arg0: i32) -> (i32, i32) {
    %c0_i32 = arith.constant 0 : i32
    %c0_i32_0 = arith.constant 0 : i32
    return %c0_i32, %arg0 : i32, i32
  }
  func.func @transform_1(%arg0: i32) -> (i32, i32) {
    %c0_i32 = arith.constant 0 : i32
    %c0_i32_0 = arith.constant 0 : i32
    %c0_i32_1 = arith.constant 0 : i32
    return %c0_i32, %c0_i32_0 : i32, i32
  }
  func.func @transform_2(%arg0: i32) -> (i32, i32) {
    %c0_i32 = arith.constant 0 : i32
    %c0_i32_0 = arith.constant 0 : i32
    %c0_i32_1 = arith.constant 0 : i32
    return %c0_i32, %c0_i32_0 : i32, i32
  }
  func.func @transform_3(%arg0: i32) -> (i32, i32) {
    %c0_i32 = arith.constant 0 : i32
    %c0_i32_0 = arith.constant 0 : i32
    return %c0_i32, %arg0 : i32, i32
  }
  func.func @transform_4(%arg0: i32) -> (i32, i32) {
    %c0_i32 = arith.constant 0 : i32
    %c0_i32_0 = arith.constant 0 : i32
    return %c0_i32, %arg0 : i32, i32
  }
  func.func @transform_5(%arg0: i32) -> (i32, i32) {
    %c0_i32 = arith.constant 0 : i32
    %c0_i32_0 = arith.constant 0 : i32
    return %c0_i32, %arg0 : i32, i32
  }
  func.func @transform_6(%arg0: i32) -> (i32, i32) {
    %c0_i32 = arith.constant 0 : i32
    %c0_i32_0 = arith.constant 0 : i32
    return %c0_i32, %arg0 : i32, i32
  }
  func.func @transform_7(%arg0: i32) -> (i32, i32) {
    %c0_i32 = arith.constant 0 : i32
    %c0_i32_0 = arith.constant 0 : i32
    return %c0_i32, %arg0 : i32, i32
  }
  func.func @transform_8(%arg0: i32) -> (i32, i32) {
    %c0_i32 = arith.constant 0 : i32
    %c0_i32_0 = arith.constant 0 : i32
    return %c0_i32, %arg0 : i32, i32
  }
}

</mosaic_0001>

<bundles_post_ra>
// kernel: smpl_knn_forward.1
= control target key start
LH: loop header
LB: loop body
LE: loop exit
PB: predicated region body
PF: predicated region fallthrough
CT: control target
= control target key end

     0   :  { %s5681_s0 = inlined_call_operand.vmem [shape: f32[4,256], index: 0, kind: input, shape index: {}]   ;;  %s5682_s1 = inlined_call_operand.vmem [shape: f32[128,3], index: 1, kind: input, shape index: {}]   ;;  %s5683_s2 = inlined_call_operand.vmem [shape: f32[17,128], index: 2, kind: input, shape index: {}]   ;;  %s5684_s3 = inlined_call_operand.vmem [shape: f32[4,256], index: 3, kind: input, shape index: {}]   ;;  %s5685_s4 = inlined_call_operand.vmem [shape: f32[3,256], index: 4, kind: input, shape index: {}]   ;;  %s5686_s5 = inlined_call_operand.vmem [shape: f32[16,256], index: 5, kind: output, shape index: {0}]   ;;  %s5687_s6 = inlined_call_operand.hbm [shape: f32[3,256], index: 6, kind: output, shape index: {1}]   ;;  %s5688_s7 = inlined_call_operand.vmem [shape: f32[9,256], index: 7, kind: output, shape index: {2}]   ;;  %s5689_s8 = inlined_call_operand.hbm [shape: f32[3,256], index: 8, kind: output, shape index: {3}]  }
   0x1   :  { %5725 = sst [smem:[#allocation15_spill]] %s5681_s0 }
   0x2   :  { %5726 = sst [smem:[#allocation16_spill]] %s5682_s1 }
   0x3   :  { %14 = vsyncpa [#allocation4], 0 }
   0x4   :  { %16 = vsyncpa [#allocation4 + $0x1], 0 }
   0x5   :  { %17 = vsyncpa [#allocation7], 0 }
   0x6   :  { %19 = vsyncpa [#allocation7 + $0x1], 0  ;;  %s3207_s27 = smov 0   ;;  %s3209_s28 = smov 0  }
   0x7   :  { %s3211_s29 = smov 0   ;;  %s3213_s30 = smov 0  }
   0x8 LB: > { %s3228_s9 = sadd.s32 4294967295, %s3153_s30   ;;  %s2601_s10 = sadd.s32 4294967294, %s3153_s30   ;;  %s3153_s30 = sphi %s3213_s30, %s5770_s30   ;;  %s3149_s29 = sphi %s3211_s29, %s5769_s29   ;;  %s3145_s28 = sphi %s3209_s28, %s5768_s28   ;;  %s3141_s27 = sphi %s3207_s27, %s5767_s27  }
   0x9   : > { %s3232_s11 = sadd.s32 1, %s3153_s30   ;;  %s152_s12 = sadd.s32 1, %s3149_s29 }
   0xa   : > { %s149_s13 = ssub.s32 %s3153_s30, %s3232_s11  ;;  %p162_p0 = scmp.ne.s32.totalorder %s3149_s29, %s3145_s28 }
   0xb   : > { %p150_p1 = scmp.eq.s32.totalorder %s149_s13, 0  ;;  %p163_p2 = scmp.eq.s32.totalorder %s3228_s9, 1 }
   0xc   : > { %p194_p3 = scmp.ne.s32.totalorder %s3145_s28, %s3141_s27  ;;  %p195_p4 = scmp.eq.s32.totalorder %s2601_s10, 1 }
   0xd   : > { %s3243_s14 = scalar_select %p150_p1, %s3149_s29, %s152_s12  }
   0xe   : > { %p3245_p5 = por %p163_p2, %p162_p0  ;;  %p3249_p6 = por %p195_p4, %p194_p3 }
   0xf   : > { %p2604_p7 = scmp.ge.s32.totalorder %s3153_s30, 1  ;;  %p292_p8 = scmp.lt.s32.totalorder %s3153_s30, 3 }
  0x11   : > { %p293_p9 = pnand %p2604_p7, %p292_p8 }
  0x13   : > { %296 = sbr.rel (%p293_p9) target bundleno = 923 (0x39b), region = 40 }
  0x18   : > { %s5729_s1 = sld [smem:[#allocation16_spill]]  ;;  %v3155_v2 = vmov 0   ;;  %v3156_v10 = vmov 1   ;;  %v3157_v17 = vmov 2   ;;  %p346_p10 = scmp.lt.s32.totalorder %s3228_s9, 1  ;;  %v455_v19 = vlaneseq }
  0x19   : > { %3032 = vset.pattern.permute.xlu1 %v3155_v2  ;;  %3031 = vset.pattern.permute.xlu0 %v3155_v2  ;;  %s5731_s0 = sld [smem:[#allocation15_spill]]  ;;  %s5421_s25 = sand.u32 1, %s3145_s28  }
  0x1a   : > { %s347_s23 = scalar_select %p346_p10, %s3228_s9, 1  ;;  %v3307_v22 = vshrl.u32 %v455_v19, 7 }
  0x1b   : > { %s2605_s26 = sshll.u32 %s5421_s25, 4 }
  0x1c   : > { %s3305_s24 = sshll.u32 %s347_s23, 2  ;;  %5730 = vst [vmem:[#allocation10_spill] sm:$0xff] %v3307_v22  ;;  %v5690_v25 = vsub.s32 0, %v3307_v22  ;;  %v541_v29 = vsub.s32 1, %v3307_v22  ;;  %s5593_s19 = scalar_lea.vmem [#allocation5], %s2605_s26 }
  0x1d   : > { %s353_s23 = scalar_lea.vmem %s5684_s3, %s3305_s24  ;;  %s357_s17 = scalar_lea.vmem %s5685_s4, %s3305_s24 }
  0x1e   : > { %v361_v0 = vld [vmem:[%s5729_s1 + $0x10] sm:$0xff]  ;;  %v359_v1 = vld [vmem:[%s5729_s1] sm:$0xff]  ;;  %v362_v3 = vld [vmem:[%s5729_s1 + $0x18] sm:$0xff] }
  0x1f   : > { %387 = vperm.xlu1 %3032, %v361_v0   ;;  %377 = vperm.xlu0 %3031, %v359_v1   ;;  %v360_v4 = vld [vmem:[%s5729_s1 + $0x8] sm:$0xff]  ;;  %v363_v6 = vld [vmem:[%s5729_s1 + $0x20] sm:$0xff]  ;;  %v366_v7 = vld [vmem:[%s5729_s1 + $0x38] sm:$0xff]  ;;  %s3313_s10 = scalar_lea.vmem %s5731_s0, %s3305_s24  ;;  %s5497_s24 = scalar_lea.vmem [#allocation2], %s2605_s26 }
  0x20   : > { %v364_v5 = vld [vmem:[%s5729_s1 + $0x28] sm:$0xff]  ;;  %v365_v8 = vld [vmem:[%s5729_s1 + $0x30] sm:$0xff]  ;;  %v371_v11 = vld [vmem:[%s5729_s1 + $0x60] sm:$0xff] }
  0x21   : > { %v368_v9 = vld [vmem:[%s5729_s1 + $0x48] sm:$0xff]  ;;  %v374_v12 = vld [vmem:[%s5729_s1 + $0x78] sm:$0xff]  ;;  %v367_v13 = vld [vmem:[%s5729_s1 + $0x40] sm:$0xff] }
  0x22   : > { %v369_v14 = vld [vmem:[%s5729_s1 + $0x50] sm:$0xff]  ;;  %v370_v15 = vld [vmem:[%s5729_s1 + $0x58] sm:$0xff]  ;;  %v372_v16 = vld [vmem:[%s5729_s1 + $0x68] sm:$0xff] }
  0x23   : > { %392 = vperm.xlu1 %3032, %v362_v3   ;;  %382 = vperm.xlu0 %3031, %v360_v4   ;;  %v373_v18 = vld [vmem:[%s5729_s1 + $0x70] sm:$0xff]  ;;  %v358_v28 = vld [vmem:[%s3313_s10] sm:$0xf] }
  0x24   : > { %v3320_v30 = vrot.slane %v358_v28, %v5690_v25  ;;  %v3325_v34 = vrot.slane %v358_v28, %v541_v29 }
  0x27   : > { %402 = vperm.xlu1 %3032, %v364_v5   ;;  %397 = vperm.xlu0 %3031, %v363_v6  }
  0x2b   : > { %412 = vperm.xlu1 %3032, %v366_v7   ;;  %407 = vperm.xlu0 %3031, %v365_v8  }
  0x2f   : > { %3033 = vset.pattern.permute.xlu1 %v3156_v10  ;;  %422 = vperm.xlu0 %3031, %v368_v9  }
  0x30   : > { %480 = vperm.xlu1 %3033, %v360_v4  }
  0x33   : > { %437 = vperm.xlu0 %3031, %v371_v11  }
  0x34   : > { %484 = vperm.xlu1 %3033, %v361_v0  }
  0x37   : > { %452 = vperm.xlu0 %3031, %v374_v12  }
  0x38   : > { %492 = vperm.xlu1 %3033, %v363_v6  }
  0x3b   : > { %3038 = vset.pattern.permute.xlu0 %v3156_v10 }
  0x3c   : > { %500 = vperm.xlu1 %3033, %v365_v8   ;;  %476 = vperm.xlu0 %3038, %v359_v1  }
  0x40   : > { %3034 = vset.pattern.permute.xlu1 %v3155_v2  ;;  %488 = vperm.xlu0 %3038, %v362_v3  }
  0x41   : > { %417 = vperm.xlu1 %3034, %v367_v13  }
  0x44   : > { %496 = vperm.xlu0 %3038, %v364_v5  }
  0x45   : > { %427 = vperm.xlu1 %3034, %v369_v14  }
  0x48   : > { %504 = vperm.xlu0 %3038, %v366_v7  }
  0x49   : > { %432 = vperm.xlu1 %3034, %v370_v15  }
  0x4c   : > { %508 = vperm.xlu0 %3038, %v367_v13  }
  0x4d   : > { %3035 = vset.pattern.permute.xlu1 %v3156_v10 }
  0x4e   : > { %512 = vperm.xlu1 %3035, %v368_v9  }
  0x50   : > { %520 = vperm.xlu0 %3038, %v370_v15  }
  0x52   : > { %516 = vperm.xlu1 %3035, %v369_v14  }
  0x54   : > { %528 = vperm.xlu0 %3038, %v372_v16  }
  0x56   : > { %3036 = vset.pattern.permute.xlu1 %v3157_v17 }
  0x57   : > { %560 = vperm.xlu1 %3036, %v359_v1  }
  0x58   : > { %3040 = vset.pattern.permute.xlu0 %v3157_v17 }
  0x59   : > { %564 = vperm.xlu0 %3040, %v360_v4  }
  0x5b   : > { %568 = vperm.xlu1 %3036, %v361_v0  }
  0x5d   : > { %576 = vperm.xlu0 %3040, %v363_v6  }
  0x5f   : > { %572 = vperm.xlu1 %3036, %v362_v3   ;;  %v625_v3 = vsub.s32 2, %v3307_v22 }
  0x61   : > { %584 = vperm.xlu0 %3040, %v365_v8  }
  0x63   : > { %580 = vperm.xlu1 %3036, %v364_v5   ;;  %v3355_v5 = vrot.slane %v358_v28, %v625_v3 }
  0x65   : > { %592 = vperm.xlu0 %3040, %v367_v13  }
  0x67   : > { %588 = vperm.xlu1 %3036, %v366_v7  }
  0x69   : > { %604 = vperm.xlu0 %3040, %v370_v15  }
  0x6b   : > { %3037 = vset.pattern.permute.xlu1 %v3155_v2 }
  0x6c   : > { %442 = vperm.xlu1 %3037, %v372_v16  }
  0x6d   : > { %612 = vperm.xlu0 %3040, %v372_v16  }
  0x70   : > { %447 = vperm.xlu1 %3037, %v373_v18  }
  0x71   : > { %620 = vperm.xlu0 %3040, %v374_v12  }
  0x74   : > { %3039 = vset.pattern.permute.xlu1 %v3156_v10 }
  0x75   : > { %524 = vperm.xlu1 %3039, %v371_v11  }
  0x79   : > { %532 = vperm.xlu1 %3039, %v373_v18  }
  0x7d   : > { %536 = vperm.xlu1 %3039, %v374_v12  }
  0x81   : > { %3041 = vset.pattern.permute.xlu1 %v3157_v17 }
  0x82   : > { %596 = vperm.xlu1 %3041, %v368_v9  }
  0x86   : > { %600 = vperm.xlu1 %3041, %v369_v14  }
  0x8a   : > { %608 = vperm.xlu1 %3041, %v371_v11  }
  0x8e   : > { %616 = vperm.xlu1 %3041, %v373_v18  }
  0x9a   : > { %v388_v20 = vpop.permute.xlu1 %387  ;;  %v378_v21 = vpop.permute.xlu0 %377 }
  0x9b   : > { %v461_v39 = vsub.f32 %v388_v20, %v3320_v30  ;;  %v459_v7 = vsub.f32 %v378_v21, %v3320_v30 }
  0x9d   : > { %v645_v46 = vmul.f32 %v461_v39, %v461_v39  ;;  %v643_v14 = vmul.f32 %v459_v7, %v459_v7 }
  0x9e   : > { %v393_v23 = vpop.permute.xlu1 %392  ;;  %v383_v24 = vpop.permute.xlu0 %382 }
  0x9f   : > { %v460_v33 = vsub.f32 %v383_v24, %v3320_v30  ;;  %v462_v11 = vsub.f32 %v393_v23, %v3320_v30 }
  0xa1   : > { %v644_v37 = vmul.f32 %v460_v33, %v460_v33 }
  0xa2   : > { %v403_v26 = vpop.permute.xlu1 %402  ;;  %v398_v27 = vpop.permute.xlu0 %397 }
  0xa3   : > { %v463_v43 = vsub.f32 %v398_v27, %v3320_v30  ;;  %v464_v12 = vsub.f32 %v403_v26, %v3320_v30  ;;  %v646_v27 = vmul.f32 %v462_v11, %v462_v11 }
  0xa5   : > { %v647_v50 = vmul.f32 %v463_v43, %v463_v43  ;;  %v648_v28 = vmul.f32 %v464_v12, %v464_v12 }
  0xa6   : > { %v3322_v31 = vpop.permute.xlu1 %412  ;;  %v408_v32 = vpop.permute.xlu0 %407 }
  0xa7   : > { %v465_v15 = vsub.f32 %v408_v32, %v3320_v30 }
  0xa9   : > { %v649_v33 = vmul.f32 %v465_v15, %v465_v15 }
  0xaa   : > { %v3327_v35 = vpop.permute.xlu0 %422 }
  0xab   : > { %v481_v36 = vpop.permute.xlu1 %480 }
  0xac   : > { %v544_v38 = vsub.f32 %v481_v36, %v3325_v34 }
  0xae   : > { %v660_v40 = vmul.f32 %v544_v38, %v544_v38  ;;  %v3331_v41 = vpop.permute.xlu0 %437 }
  0xaf   : > { %v485_v42 = vpop.permute.xlu1 %484 }
  0xb0   : > { %v3334_v44 = vadd.f32 %v660_v40, %v644_v37  ;;  %v545_v45 = vsub.f32 %v485_v42, %v3325_v34 }
  0xb2   : > { %v661_v47 = vmul.f32 %v545_v45, %v545_v45  ;;  %v3337_v48 = vpop.permute.xlu0 %452 }
  0xb3   : > { %v493_v49 = vpop.permute.xlu1 %492 }
  0xb4   : > { %v3339_v51 = vadd.f32 %v661_v47, %v645_v46  ;;  %v547_v52 = vsub.f32 %v493_v49, %v3325_v34 }
  0xb6   : > { %v663_v53 = vmul.f32 %v547_v52, %v547_v52 }
  0xb7   : > { %v501_v54 = vpop.permute.xlu1 %500  ;;  %v477_v55 = vpop.permute.xlu0 %476 }
  0xb8   : > { %v679_v56 = vadd.f32 %v663_v53, %v647_v50  ;;  %v543_v8 = vsub.f32 %v477_v55, %v3325_v34  ;;  %v549_v16 = vsub.f32 %v501_v54, %v3325_v34  ;;  %v466_v50 = vsub.f32 %v3322_v31, %v3320_v30 }
  0xba   : > { %v659_v17 = vmul.f32 %v543_v8, %v543_v8  ;;  %v665_v32 = vmul.f32 %v549_v16, %v549_v16  ;;  %v650_v11 = vmul.f32 %v466_v50, %v466_v50 }
  0xbb   : > { %v489_v57 = vpop.permute.xlu0 %488 }
  0xbc   : > { %v418_v58 = vpop.permute.xlu1 %417  ;;  %v675_v36 = vadd.f32 %v659_v17, %v643_v14  ;;  %v546_v38 = vsub.f32 %v489_v57, %v3325_v34  ;;  %v681_v57 = vadd.f32 %v665_v32, %v649_v33 }
  0xbd   : > { %v467_v39 = vsub.f32 %v418_v58, %v3320_v30 }
  0xbf   : > { %v497_v59 = vpop.permute.xlu0 %496 }
  0xc0   : > { %v3342_v60 = vpop.permute.xlu1 %427  ;;  %v548_v18 = vsub.f32 %v497_v59, %v3325_v34 }
  0xc1   : > { %v469_v50 = vsub.f32 %v3342_v60, %v3320_v30 }
  0xc2   : > { %v664_v40 = vmul.f32 %v548_v18, %v548_v18 }
  0xc3   : > { %v505_v61 = vpop.permute.xlu0 %504 }
  0xc4   : > { %v3344_v62 = vpop.permute.xlu1 %432  ;;  %v550_v42 = vsub.f32 %v505_v61, %v3325_v34  ;;  %v680_v3 = vadd.f32 %v664_v40, %v648_v28  ;;  %v468_v40 = vsub.f32 %v3327_v35, %v3320_v30 }
  0xc6   : > { %v652_v35 = vmul.f32 %v468_v40, %v468_v40 }
  0xc7   : > { %v509_v63 = vpop.permute.xlu0 %508 }
  0xc8   : > { %v551_v23 = vsub.f32 %v509_v63, %v3325_v34  ;;  %v662_v63 = vmul.f32 %v546_v38, %v546_v38 }
  0xc9   : > { %v3346_v0 = vpop.permute.xlu1 %512 }
  0xca   : > { %v667_v52 = vmul.f32 %v551_v23, %v551_v23 }
  0xcb   : > { %v3348_v1 = vpop.permute.xlu0 %520 }
  0xcd   : > { %v3350_v2 = vpop.permute.xlu1 %516 }
  0xcf   : > { %v3353_v4 = vpop.permute.xlu0 %528 }
  0xd2   : > { %v561_v6 = vpop.permute.xlu1 %560 }
  0xd3   : > { %v627_v10 = vsub.f32 %v561_v6, %v3355_v5  ;;  %v666_v6 = vmul.f32 %v550_v42, %v550_v42  ;;  %v471_v42 = vsub.f32 %v3331_v41, %v3320_v30  ;;  %v554_v41 = vsub.f32 %v3348_v1, %v3325_v34 }
  0xd4   : > { %v565_v9 = vpop.permute.xlu0 %564  ;;  %v653_v1 = vmul.f32 %v469_v50, %v469_v50 }
  0xd5   : > { %v691_v20 = vmul.f32 %v627_v10, %v627_v10  ;;  %v628_v26 = vsub.f32 %v565_v9, %v3355_v5 }
  0xd6   : > { %v569_v13 = vpop.permute.xlu1 %568 }
  0xd7   : > { %v629_v21 = vsub.f32 %v569_v13, %v3355_v5  ;;  %v3372_v45 = vadd.f32 %v691_v20, %v675_v36  ;;  %v692_v53 = vmul.f32 %v628_v26, %v628_v26  ;;  %v682_v20 = vadd.f32 %v666_v6, %v650_v11 }
  0xd8   : > { %v577_v19 = vpop.permute.xlu0 %576 }
  0xd9   : > { %v631_v24 = vsub.f32 %v577_v19, %v3355_v5  ;;  %v693_v46 = vmul.f32 %v629_v21, %v629_v21  ;;  %v3390_v13 = vadd.f32 %v692_v53, %v3334_v44  ;;  %v678_v19 = vadd.f32 %v662_v63, %v646_v27 }
  0xda   : > { %v573_v29 = vpop.permute.xlu1 %572 }
  0xdb   : > { %v695_v37 = vmul.f32 %v631_v24, %v631_v24  ;;  %v630_v54 = vsub.f32 %v573_v29, %v3355_v5  ;;  %v3384_v8 = vadd.f32 %v693_v46, %v3339_v51  ;;  %v474_v46 = vsub.f32 %v3337_v48, %v3320_v30 }
  0xdc   : > { %v585_v43 = vpop.permute.xlu0 %584 }
  0xdd   : > { %v3374_v47 = vadd.f32 %v695_v37, %v679_v56  ;;  %v633_v49 = vsub.f32 %v585_v43, %v3355_v5  ;;  %v651_v56 = vmul.f32 %v467_v39, %v467_v39  ;;  %v694_v14 = vmul.f32 %v630_v54, %v630_v54 }
  0xde   : > { %v581_v55 = vpop.permute.xlu1 %580  ;;  %v552_v39 = vsub.f32 %v3346_v0, %v3325_v34  ;;  %v553_v43 = vsub.f32 %v3350_v2, %v3325_v34 }
  0xdf   : > { %v723_v58 = vmin.f32 %v3372_v45, %v3374_v47  ;;  %v697_v59 = vmul.f32 %v633_v49, %v633_v49  ;;  %v632_v61 = vsub.f32 %v581_v55, %v3355_v5  ;;  %v683_v12 = vadd.f32 %v667_v52, %v651_v56 }
  0xe0   : > { %v593_v7 = vpop.permute.xlu0 %592  ;;  %v3401_v44 = vadd.f32 %v694_v14, %v678_v19  ;;  %v668_v52 = vmul.f32 %v552_v39, %v552_v39  ;;  %v669_v48 = vmul.f32 %v553_v43, %v553_v43 }
  0xe1   : > { %v3386_v31 = vadd.f32 %v697_v59, %v681_v57  ;;  %v696_v9 = vmul.f32 %v632_v61, %v632_v61  ;;  %v635_v10 = vsub.f32 %v593_v7, %v3355_v5  ;;  %v655_v57 = vmul.f32 %v471_v42, %v471_v42 }
  0xe2   : > { %v589_v15 = vpop.permute.xlu1 %588  ;;  %v658_v59 = vmul.f32 %v474_v46, %v474_v46  ;;  %v470_v61 = vsub.f32 %v3344_v62, %v3320_v30  ;;  %v684_v6 = vadd.f32 %v668_v52, %v652_v35 }
  0xe3   : > { %v725_v16 = vmin.f32 %v3384_v8, %v3386_v31  ;;  %v3394_v17 = vadd.f32 %v696_v9, %v680_v3  ;;  %v699_v18 = vmul.f32 %v635_v10, %v635_v10  ;;  %v634_v51 = vsub.f32 %v589_v15, %v3355_v5 }
  0xe4   : > { %v605_v37 = vpop.permute.xlu0 %604  ;;  %v670_v10 = vmul.f32 %v554_v41, %v554_v41  ;;  %v685_v15 = vadd.f32 %v669_v48, %v653_v1  ;;  %v654_v19 = vmul.f32 %v470_v61, %v470_v61 }
  0xe5   : > { %v724_v21 = vmin.f32 %v3390_v13, %v3394_v17  ;;  %v3399_v24 = vadd.f32 %v699_v18, %v683_v12  ;;  %v698_v28 = vmul.f32 %v634_v51, %v634_v51  ;;  %v638_v63 = vsub.f32 %v605_v37, %v3355_v5 }
  0xe7   : > { %v3404_v23 = vmin.f32 %v723_v58, %v3399_v24  ;;  %v3406_v26 = vadd.f32 %v698_v28, %v682_v20  ;;  %v443_v29 = vpop.permute.xlu1 %442  ;;  %v556_v58 = vsub.f32 %v3353_v4, %v3325_v34  ;;  %v702_v20 = vmul.f32 %v638_v63, %v638_v63 }
  0xe8   : > { %v472_v53 = vsub.f32 %v443_v29, %v3320_v30  ;;  %v613_v0 = vpop.permute.xlu0 %612 }
  0xe9   : > { %v726_v33 = vmin.f32 %v3401_v44, %v3406_v26  ;;  %v640_v56 = vsub.f32 %v613_v0, %v3355_v5  ;;  %v672_v18 = vmul.f32 %v556_v58, %v556_v58 }
  0xea   : > { %v656_v7 = vmul.f32 %v472_v53, %v472_v53  ;;  %v5691_v53 = vmov 0.0  }
  0xeb   : > { %v448_v32 = vpop.permute.xlu1 %447  ;;  %v704_v28 = vmul.f32 %v640_v56, %v640_v56  ;;  %2736 = vmatprep.subr.mxu0 %v5691_v53  ;;  %2777 = vmatprep.subr.mxu1 %v5691_v53 }
  0xec   : > { %v621_v12 = vpop.permute.xlu0 %620  ;;  %v473_v29 = vsub.f32 %v448_v32, %v3320_v30  ;;  %v688_v37 = vadd.f32 %v672_v18, %v656_v7 }
  0xee   : > { %v657_v50 = vmul.f32 %v473_v29, %v473_v29  ;;  %v3455_v0 = vadd.f32 %v704_v28, %v688_v37 }
  0xf0   : > { %v525_v27 = vpop.permute.xlu1 %524 }
  0xf1   : > { %v555_v55 = vsub.f32 %v525_v27, %v3325_v34 }
  0xf3   : > { %v671_v11 = vmul.f32 %v555_v55, %v555_v55 }
  0xf4   : > { %v533_v36 = vpop.permute.xlu1 %532 }
  0xf5   : > { %v557_v4 = vsub.f32 %v533_v36, %v3325_v34  ;;  %v687_v36 = vadd.f32 %v671_v11, %v655_v57 }
  0xf7   : > { %v673_v42 = vmul.f32 %v557_v4, %v557_v4 }
  0xf8   : > { %v537_v38 = vpop.permute.xlu1 %536 }
  0xf9   : > { %v558_v2 = vsub.f32 %v537_v38, %v3325_v34  ;;  %v642_v38 = vsub.f32 %v621_v12, %v3355_v5  ;;  %v686_v34 = vadd.f32 %v670_v10, %v654_v19  ;;  %v689_v41 = vadd.f32 %v673_v42, %v657_v50 }
  0xfb   : > { %v674_v14 = vmul.f32 %v558_v2, %v558_v2 }
  0xfd   : > { %v597_v49 = vpop.permute.xlu1 %596  ;;  %v690_v43 = vadd.f32 %v674_v14, %v658_v59 }
  0xfe   : > { %v636_v54 = vsub.f32 %v597_v49, %v3355_v5  ;;  %v3451_v49 = vadd.f32 %v702_v20, %v686_v34 }
 0x100   : > { %v700_v60 = vmul.f32 %v636_v54, %v636_v54  ;;  %v706_v54 = vmul.f32 %v642_v38, %v642_v38  ;;  %v730_v48 = vmin.f32 %v726_v33, %v3451_v49 }
 0x101   : > { %v601_v3 = vpop.permute.xlu1 %600 }
 0x102   : > { %v637_v9 = vsub.f32 %v601_v3, %v3355_v5  ;;  %v3436_v51 = vadd.f32 %v700_v60, %v684_v6  ;;  %v3460_v55 = vadd.f32 %v706_v54, %v690_v43 }
 0x104   : > { %v701_v62 = vmul.f32 %v637_v9, %v637_v9  ;;  %v728_v46 = vmin.f32 %v724_v21, %v3436_v51  ;;  %v734_v59 = vmin.f32 %v730_v48, %v3460_v55 }
 0x105   : > { %v609_v27 = vpop.permute.xlu1 %608 }
 0x106   : > { %v3440_v39 = vadd.f32 %v701_v62, %v685_v15  ;;  %v639_v40 = vsub.f32 %v609_v27, %v3355_v5 }
 0x108   : > { %v729_v30 = vmin.f32 %v725_v16, %v3440_v39  ;;  %v703_v32 = vmul.f32 %v639_v40, %v639_v40  ;;  %v732_v16 = vmin.f32 %v728_v46, %v3455_v0 }
 0x109   : > { %v617_v52 = vpop.permute.xlu1 %616 }
 0x10a   : > { %v3457_v35 = vadd.f32 %v703_v32, %v687_v36  ;;  %v641_v21 = vsub.f32 %v617_v52, %v3355_v5 }
 0x10c   : > { %v731_v2 = vmin.f32 %v3404_v23, %v3457_v35  ;;  %v705_v57 = vmul.f32 %v641_v21, %v641_v21 }
 0x10e   : > { %v735_v58 = vmin.f32 %v731_v2, %v732_v16  ;;  %v3469_v60 = vadd.f32 %v705_v57, %v689_v41 }
 0x110   : > { %v733_v5 = vmin.f32 %v729_v30, %v3469_v60 }
 0x112   : > { %v736_v61 = vmin.f32 %v733_v5, %v734_v59 }
 0x114   : > { %v737_v63 = vmin.f32 %v735_v58, %v736_v61 }
 0x116   : > { %v738_v56 = vrot.slane %v737_v63, 4 }
 0x118   : > { %v739_v3 = vmin.f32 %v737_v63, %v738_v56 }
 0x11a   : > { %v740_v1 = vrot.slane %v739_v3, 2 }
 0x11c   : > { %v741_v6 = vmin.f32 %v739_v3, %v740_v1 }
 0x11e   : > { %v742_v23 = vrot.slane %v741_v6, 1 }
 0x120   : > { %v3473_v7 = vmin.f32 %v741_v6, %v742_v23 }
 0x122   : > { %vm744_vm0 = vcmp.le.f32.partialorder %v3372_v45, %v3473_v7  ;;  %vm745_vm1 = vcmp.le.f32.partialorder %v3390_v13, %v3473_v7  ;;  %vm746_vm2 = vcmp.le.f32.partialorder %v3384_v8, %v3473_v7  ;;  %vm747_vm3 = vcmp.le.f32.partialorder %v3401_v44, %v3473_v7 }
 0x123   : > { %vm748_vm4 = vcmp.le.f32.partialorder %v3374_v47, %v3473_v7  ;;  %vm749_vm5 = vcmp.le.f32.partialorder %v3394_v17, %v3473_v7  ;;  %vm750_vm6 = vcmp.le.f32.partialorder %v3386_v31, %v3473_v7  ;;  %vm751_vm7 = vcmp.le.f32.partialorder %v3406_v26, %v3473_v7 }
 0x124   : > { %vm752_vm8 = vcmp.le.f32.partialorder %v3399_v24, %v3473_v7  ;;  %vm754_vm9 = vcmp.le.f32.partialorder %v3440_v39, %v3473_v7  ;;  %vm753_vm10 = vcmp.le.f32.partialorder %v3436_v51, %v3473_v7  ;;  %v760_v33 = vmin.f32 %v3473_v7, 4.0 }
 0x125   : > { %v3502_v9 = vsel %vm744_vm0, 1e+30, %v3372_v45  ;;  %v3508_v10 = vsel %vm745_vm1, 1e+30, %v3390_v13  ;;  %vm755_vm11 = vcmp.le.f32.partialorder %v3451_v49, %v3473_v7  ;;  %v3516_v11 = vsel %vm746_vm2, 1e+30, %v3384_v8 }
 0x126   : > { %v3522_v12 = vsel %vm747_vm3, 1e+30, %v3401_v44  ;;  %v3528_v4 = vsel %vm748_vm4, 1e+30, %v3374_v47  ;;  %v761_v14 = vsub.f32 0.0, %v760_v33  ;;  %vm756_vm12 = vcmp.le.f32.partialorder %v3457_v35, %v3473_v7 }
 0x127   : > { %v3534_v15 = vsel %vm749_vm5, 1e+30, %v3394_v17  ;;  %v3540_v18 = vsel %vm750_vm6, 1e+30, %v3386_v31  ;;  %v796_v62 = vmin.f32 %v3502_v9, %v3528_v4  ;;  %v3550_v19 = vsel %vm751_vm7, 1e+30, %v3406_v26 }
 0x128   : > { %v3556_v20 = vsel %vm752_vm8, 1e+30, %v3399_v24  ;;  %v797_v28 = vmin.f32 %v3508_v10, %v3534_v15  ;;  %vm757_vm13 = vcmp.le.f32.partialorder %v3455_v0, %v3473_v7  ;;  %v762_v29 = vmul.f32 1.442695, %v761_v14 }
 0x129   : > { %v3566_v27 = vsel %vm754_vm9, 1e+30, %v3440_v39  ;;  %v798_v37 = vmin.f32 %v3516_v11, %v3540_v18  ;;  %vm758_vm14 = vcmp.le.f32.partialorder %v3469_v60, %v3473_v7  ;;  %vm759_vm15 = vcmp.le.f32.partialorder %v3460_v55, %v3473_v7 }
 0x12a   : > { %v3578_v38 = vsel %vm753_vm10, 1e+30, %v3436_v51  ;;  %v799_v40 = vmin.f32 %v3522_v12, %v3550_v19  ;;  %3042 = vpow2.f32 %v762_v29  ;;  %v3586_v34 = vsel %vm755_vm11, 1e+30, %v3451_v49 }
 0x12b   : > { %v800_v36 = vmin.f32 %v796_v62, %v3556_v20  ;;  %v801_v42 = vmin.f32 %v797_v28, %v3578_v38  ;;  %v3594_v43 = vsel %vm756_vm12, 1e+30, %v3457_v35  ;;  %v3600_v46 = vsel %vm757_vm13, 1e+30, %v3455_v0 }
 0x12c   : > { %v802_v30 = vmin.f32 %v798_v37, %v3566_v27  ;;  %v803_v32 = vmin.f32 %v799_v40, %v3586_v34  ;;  %v3608_v50 = vsel %vm758_vm14, 1e+30, %v3469_v60  ;;  %v3614_v52 = vsel %vm759_vm15, 1e+30, %v3460_v55 }
 0x12d   : > { %v804_v54 = vmin.f32 %v800_v36, %v3594_v43  ;;  %v805_v21 = vmin.f32 %v801_v42, %v3600_v46 }
 0x12e   : > { %v806_v41 = vmin.f32 %v802_v30, %v3608_v50  ;;  %v807_v16 = vmin.f32 %v803_v32, %v3614_v52 }
 0x12f   : > { %v808_v2 = vmin.f32 %v804_v54, %v805_v21 }
 0x130   : > { %v809_v57 = vmin.f32 %v806_v41, %v807_v16 }
 0x132   : > { %v810_v48 = vmin.f32 %v808_v2, %v809_v57 }
 0x134   : > { %v811_v58 = vrot.slane %v810_v48, 4 }
 0x136   : > { %v812_v59 = vmin.f32 %v810_v48, %v811_v58 }
 0x137   : > { %v3043_v5 = vpop.eup %3042 }
 0x138   : > { %v813_v61 = vrot.slane %v812_v59, 2  ;;  %v3623_v63 = vsel %vm746_vm2, %v3043_v5, 0.0  ;;  %v3628_v56 = vsel %vm750_vm6, %v3043_v5, 0.0  ;;  %v3633_v3 = vsel %vm754_vm9, %v3043_v5, 0.0 }
 0x139   : > { %v3638_v1 = vsel %vm755_vm11, %v3043_v5, 0.0  ;;  %v3643_v8 = vsel %vm758_vm14, %v3043_v5, 0.0  ;;  %v3648_v31 = vsel %vm759_vm15, %v3043_v5, 0.0  ;;  %v3653_v39 = vsel %vm757_vm13, %v3043_v5, 0.0 }
 0x13a   : > { %v814_v6 = vmin.f32 %v812_v59, %v813_v61  ;;  %v3658_v49 = vsel %vm756_vm12, %v3043_v5, 0.0  ;;  %v3663_v60 = vsel %vm753_vm10, %v3043_v5, 0.0  ;;  %v3668_v55 = vsel %vm752_vm8, %v3043_v5, 0.0 }
 0x13b   : > { %v3673_v0 = vsel %vm751_vm7, %v3043_v5, 0.0  ;;  %v3678_v35 = vsel %vm749_vm5, %v3043_v5, 0.0  ;;  %v3683_v51 = vsel %vm748_vm4, %v3043_v5, 0.0  ;;  %v3688_v24 = vsel %vm747_vm3, %v3043_v5, 0.0 }
 0x13c   : > { %v815_v23 = vrot.slane %v814_v6, 1  ;;  %v3693_v26 = vsel %vm745_vm1, %v3043_v5, 0.0  ;;  %v3698_v17 = vsel %vm744_vm0, %v3043_v5, 0.0 }
 0x13e   : > { %v3700_v33 = vmin.f32 %v814_v6, %v815_v23 }
 0x140   : > { %vm817_vm2 = vcmp.le.f32.partialorder %v3502_v9, %v3700_v33  ;;  %vm818_vm4 = vcmp.le.f32.partialorder %v3508_v10, %v3700_v33  ;;  %vm819_vm3 = vcmp.le.f32.partialorder %v3516_v11, %v3700_v33  ;;  %vm820_vm1 = vcmp.le.f32.partialorder %v3522_v12, %v3700_v33 }
 0x141   : > { %vm821_vm5 = vcmp.le.f32.partialorder %v3528_v4, %v3700_v33  ;;  %vm822_vm0 = vcmp.le.f32.partialorder %v3534_v15, %v3700_v33  ;;  %vm823_vm6 = vcmp.le.f32.partialorder %v3540_v18, %v3700_v33  ;;  %vm824_vm7 = vcmp.le.f32.partialorder %v3550_v19, %v3700_v33 }
 0x142   : > { %vm825_vm8 = vcmp.le.f32.partialorder %v3556_v20, %v3700_v33  ;;  %vm826_vm9 = vcmp.le.f32.partialorder %v3578_v38, %v3700_v33  ;;  %vm827_vm10 = vcmp.le.f32.partialorder %v3566_v27, %v3700_v33  ;;  %vm828_vm11 = vcmp.le.f32.partialorder %v3586_v34, %v3700_v33 }
 0x143   : > { %vm829_vm12 = vcmp.le.f32.partialorder %v3594_v43, %v3700_v33  ;;  %vm830_vm13 = vcmp.le.f32.partialorder %v3600_v46, %v3700_v33  ;;  %vm831_vm14 = vcmp.le.f32.partialorder %v3608_v50, %v3700_v33  ;;  %vm832_vm15 = vcmp.le.f32.partialorder %v3614_v52, %v3700_v33 }
 0x144   : > { %v833_v45 = vmin.f32 %v3700_v33, 4.0  ;;  %v3739_v47 = vsel %vm817_vm2, 1e+30, %v3502_v9  ;;  %v3745_v13 = vsel %vm818_vm4, 1e+30, %v3508_v10 }
 0x145   : > { %v3751_v44 = vsel %vm819_vm3, 1e+30, %v3516_v11  ;;  %v3757_v7 = vsel %vm820_vm1, 1e+30, %v3522_v12  ;;  %v3763_v14 = vsel %vm821_vm5, 1e+30, %v3528_v4 }
 0x146   : > { %v834_v62 = vsub.f32 0.0, %v833_v45  ;;  %v3769_v28 = vsel %vm822_vm0, 1e+30, %v3534_v15  ;;  %v3775_v29 = vsel %vm823_vm6, 1e+30, %v3540_v18  ;;  %v869_v37 = vmin.f32 %v3739_v47, %v3763_v14 }
 0x147   : > { %5732 = vst [vmem:[#allocation11_spill] sm:$0xff] %v3775_v29  ;;  %v3783_v40 = vsel %vm824_vm7, 1e+30, %v3550_v19  ;;  %v3789_v36 = vsel %vm825_vm8, 1e+30, %v3556_v20  ;;  %v870_v30 = vmin.f32 %v3745_v13, %v3769_v28  ;;  %v871_v41 = vmin.f32 %v3751_v44, %v3775_v29 }
 0x148   : > { %5733 = vst [vmem:[#allocation12_spill] sm:$0xff] %v3783_v40  ;;  %5734 = vst [vmem:[#allocation13_spill] sm:$0xff] %v3789_v36  ;;  %v3795_v42 = vsel %vm826_vm9, 1e+30, %v3578_v38  ;;  %v835_v32 = vmul.f32 1.442695, %v834_v62  ;;  %v872_v48 = vmin.f32 %v3757_v7, %v3783_v40  ;;  %v873_v59 = vmin.f32 %v869_v37, %v3789_v36 }
 0x149   : > { %v3803_v54 = vsel %vm827_vm10, 1e+30, %v3566_v27  ;;  %v3809_v21 = vsel %vm828_vm11, 1e+30, %v3586_v34  ;;  %v3817_v16 = vsel %vm829_vm12, 1e+30, %v3594_v43  ;;  %v874_v5 = vmin.f32 %v870_v30, %v3795_v42 }
 0x14a   : > { %v3823_v2 = vsel %vm830_vm13, 1e+30, %v3600_v46  ;;  %v3829_v57 = vsel %vm831_vm14, 1e+30, %v3608_v50  ;;  %3044 = vpow2.f32 %v835_v32  ;;  %v3837_v58 = vsel %vm832_vm15, 1e+30, %v3614_v52 }
 0x14b   : > { %v875_v61 = vmin.f32 %v871_v41, %v3803_v54  ;;  %v876_v6 = vmin.f32 %v872_v48, %v3809_v21  ;;  %v877_v23 = vmin.f32 %v873_v59, %v3817_v16  ;;  %v878_v45 = vmin.f32 %v874_v5, %v3823_v2 }
 0x14d   : > { %v879_v62 = vmin.f32 %v875_v61, %v3829_v57  ;;  %v880_v32 = vmin.f32 %v876_v6, %v3837_v58  ;;  %v881_v25 = vmin.f32 %v877_v23, %v878_v45 }
 0x14e   : > { %v5735_v9 = vld [vmem:[#allocation11_spill] sm:$0xff] }
 0x14f   : > { %v882_v53 = vmin.f32 %v879_v62, %v880_v32  ;;  %v5736_v10 = vld [vmem:[#allocation12_spill] sm:$0xff]  ;;  %v5737_v11 = vld [vmem:[#allocation13_spill] sm:$0xff] }
 0x151   : > { %v883_v22 = vmin.f32 %v881_v25, %v882_v53 }
 0x153   : > { %v884_v40 = vrot.slane %v883_v22, 4 }
 0x155   : > { %v885_v29 = vmin.f32 %v883_v22, %v884_v40 }
 0x157   : > { %v3045_v37 = vpop.eup %3044  ;;  %v886_v36 = vrot.slane %v885_v29, 2 }
 0x158   : > { %v3851_v30 = vsel %vm827_vm10, %v3045_v37, %v3633_v3  ;;  %v3857_v41 = vsel %vm831_vm14, %v3045_v37, %v3643_v8  ;;  %v3863_v25 = vsel %vm832_vm15, %v3045_v37, %v3648_v31  ;;  %v3869_v22 = vsel %vm830_vm13, %v3045_v37, %v3653_v39 }
 0x159   : > { %v887_v53 = vmin.f32 %v885_v29, %v886_v36  ;;  %v3875_v27 = vsel %vm829_vm12, %v3045_v37, %v3658_v49  ;;  %v3881_v50 = vsel %vm828_vm11, %v3045_v37, %v3638_v1  ;;  %v3887_v46 = vsel %vm826_vm9, %v3045_v37, %v3663_v60 }
 0x15a   : > { %v3893_v52 = vsel %vm825_vm8, %v3045_v37, %v3668_v55  ;;  %v3899_v43 = vsel %vm824_vm7, %v3045_v37, %v3673_v0  ;;  %v3905_v34 = vsel %vm823_vm6, %v3045_v37, %v3628_v56  ;;  %v3911_v38 = vsel %vm822_vm0, %v3045_v37, %v3678_v35 }
 0x15b   : > { %v888_v20 = vrot.slane %v887_v53, 1  ;;  %v3917_v19 = vsel %vm821_vm5, %v3045_v37, %v3683_v51  ;;  %v3923_v18 = vsel %vm820_vm1, %v3045_v37, %v3688_v24  ;;  %v3929_v15 = vsel %vm819_vm3, %v3045_v37, %v3623_v63 }
 0x15c   : > { %v3935_v56 = vsel %vm818_vm4, %v3045_v37, %v3693_v26  ;;  %v3941_v4 = vsel %vm817_vm2, %v3045_v37, %v3698_v17 }
 0x15d   : > { %v3943_v12 = vmin.f32 %v887_v53, %v888_v20 }
 0x15f   : > { %vm890_vm1 = vcmp.le.f32.partialorder %v3739_v47, %v3943_v12  ;;  %vm891_vm3 = vcmp.le.f32.partialorder %v3745_v13, %v3943_v12  ;;  %vm892_vm5 = vcmp.le.f32.partialorder %v3751_v44, %v3943_v12  ;;  %vm893_vm4 = vcmp.le.f32.partialorder %v3757_v7, %v3943_v12 }
 0x160   : > { %vm894_vm0 = vcmp.le.f32.partialorder %v3763_v14, %v3943_v12  ;;  %vm895_vm2 = vcmp.le.f32.partialorder %v3769_v28, %v3943_v12  ;;  %vm896_vm6 = vcmp.le.f32.partialorder %v5735_v9, %v3943_v12  ;;  %vm897_vm7 = vcmp.le.f32.partialorder %v5736_v10, %v3943_v12 }
 0x161   : > { %vm898_vm8 = vcmp.le.f32.partialorder %v5737_v11, %v3943_v12  ;;  %vm899_vm9 = vcmp.le.f32.partialorder %v3795_v42, %v3943_v12  ;;  %vm900_vm10 = vcmp.le.f32.partialorder %v3803_v54, %v3943_v12  ;;  %vm901_vm11 = vcmp.le.f32.partialorder %v3809_v21, %v3943_v12 }
 0x162   : > { %vm902_vm12 = vcmp.le.f32.partialorder %v3817_v16, %v3943_v12  ;;  %vm903_vm13 = vcmp.le.f32.partialorder %v3823_v2, %v3943_v12  ;;  %vm904_vm14 = vcmp.le.f32.partialorder %v3829_v57, %v3943_v12  ;;  %vm905_vm15 = vcmp.le.f32.partialorder %v3837_v58, %v3943_v12 }
 0x163   : > { %v906_v63 = vmin.f32 %v3943_v12, 4.0  ;;  %v3982_v3 = vsel %vm890_vm1, 1e+30, %v3739_v47  ;;  %v3988_v1 = vsel %vm891_vm3, 1e+30, %v3745_v13 }
 0x164   : > { %v3994_v8 = vsel %vm892_vm5, 1e+30, %v3751_v44  ;;  %v4000_v31 = vsel %vm893_vm4, 1e+30, %v3757_v7  ;;  %v4006_v39 = vsel %vm894_vm0, 1e+30, %v3763_v14 }
 0x165   : > { %5738 = vst [vmem:[#allocation11_spill] sm:$0xff] %v4000_v31  ;;  %v907_v49 = vsub.f32 0.0, %v906_v63  ;;  %v4012_v60 = vsel %vm895_vm2, 1e+30, %v3769_v28  ;;  %v4018_v55 = vsel %vm896_vm6, 1e+30, %v5735_v9  ;;  %v942_v0 = vmin.f32 %v3982_v3, %v4006_v39 }
 0x166   : > { %v4026_v35 = vsel %vm897_vm7, 1e+30, %v5736_v10  ;;  %v4032_v51 = vsel %vm898_vm8, 1e+30, %v5737_v11  ;;  %v4038_v24 = vsel %vm899_vm9, 1e+30, %v3795_v42  ;;  %v943_v26 = vmin.f32 %v3988_v1, %v4012_v60 }
 0x167   : > { %5739 = vst [vmem:[#allocation12_spill] sm:$0xff] %v4026_v35  ;;  %5740 = vst [vmem:[#allocation13_spill] sm:$0xff] %v4032_v51  ;;  %v908_v17 = vmul.f32 1.442695, %v907_v49  ;;  %v4046_v33 = vsel %vm900_vm10, 1e+30, %v3803_v54  ;;  %v944_v40 = vmin.f32 %v3994_v8, %v4018_v55  ;;  %v945_v5 = vmin.f32 %v4000_v31, %v4026_v35 }
 0x168   : > { %v4052_v29 = vsel %vm901_vm11, 1e+30, %v3809_v21  ;;  %v4060_v36 = vsel %vm902_vm12, 1e+30, %v3817_v16  ;;  %v4066_v48 = vsel %vm903_vm13, 1e+30, %v3823_v2  ;;  %v946_v6 = vmin.f32 %v942_v0, %v4032_v51 }
 0x169   : > { %v4072_v59 = vsel %vm904_vm14, 1e+30, %v3829_v57  ;;  %3046 = vpow2.f32 %v908_v17  ;;  %v4080_v61 = vsel %vm905_vm15, 1e+30, %v3837_v58  ;;  %v947_v23 = vmin.f32 %v943_v26, %v4038_v24 }
 0x16a   : > { %v948_v45 = vmin.f32 %v944_v40, %v4046_v33  ;;  %v949_v62 = vmin.f32 %v945_v5, %v4052_v29  ;;  %v950_v32 = vmin.f32 %v946_v6, %v4060_v36 }
 0x16b   : > { %v951_v37 = vmin.f32 %v947_v23, %v4066_v48 }
 0x16c   : > { %v952_v53 = vmin.f32 %v948_v45, %v4072_v59  ;;  %v953_v20 = vmin.f32 %v949_v62, %v4080_v61 }
 0x16d   : > { %v954_v63 = vmin.f32 %v950_v32, %v951_v37 }
 0x16e   : > { %v955_v49 = vmin.f32 %v952_v53, %v953_v20  ;;  %v5741_v47 = vld [vmem:[#allocation13_spill] sm:$0xff] }
 0x170   : > { %v956_v17 = vmin.f32 %v954_v63, %v955_v49 }
 0x172   : > { %v957_v35 = vrot.slane %v956_v17, 4 }
 0x174   : > { %v958_v31 = vmin.f32 %v956_v17, %v957_v35 }
 0x176   : > { %v3047_v0 = vpop.eup %3046  ;;  %v959_v51 = vrot.slane %v958_v31, 2 }
 0x177   : > { %v4094_v26 = vsel %vm904_vm14, %v3047_v0, %v3857_v41  ;;  %v4100_v40 = vsel %vm905_vm15, %v3047_v0, %v3863_v25  ;;  %v4106_v5 = vsel %vm903_vm13, %v3047_v0, %v3869_v22  ;;  %v4112_v35 = vsel %vm902_vm12, %v3047_v0, %v3875_v27 }
 0x178   : > { %v960_v57 = vmin.f32 %v958_v31, %v959_v51  ;;  %v4118_v58 = vsel %vm901_vm11, %v3047_v0, %v3881_v50  ;;  %v4124_v2 = vsel %vm900_vm10, %v3047_v0, %v3851_v30  ;;  %v4130_v16 = vsel %vm899_vm9, %v3047_v0, %v3887_v46  ;;  %v5742_v46 = vld [vmem:[#allocation11_spill] sm:$0xff] }
 0x179   : > { %v4136_v41 = vsel %vm898_vm8, %v3047_v0, %v3893_v52  ;;  %v4142_v21 = vsel %vm897_vm7, %v3047_v0, %v3899_v43  ;;  %v4148_v54 = vsel %vm896_vm6, %v3047_v0, %v3905_v34  ;;  %v4154_v42 = vsel %vm895_vm2, %v3047_v0, %v3911_v38  ;;  %v5743_v38 = vld [vmem:[#allocation12_spill] sm:$0xff] }
 0x17a   : > { %v961_v30 = vrot.slane %v960_v57, 1  ;;  %v4160_v25 = vsel %vm894_vm0, %v3047_v0, %v3917_v19  ;;  %v4166_v22 = vsel %vm893_vm4, %v3047_v0, %v3923_v18  ;;  %v4172_v28 = vsel %vm892_vm5, %v3047_v0, %v3929_v15 }
 0x17b   : > { %v4178_v27 = vsel %vm891_vm3, %v3047_v0, %v3935_v56  ;;  %v4184_v14 = vsel %vm890_vm1, %v3047_v0, %v3941_v4 }
 0x17c   : > { %v4186_v7 = vmin.f32 %v960_v57, %v961_v30 }
 0x17e   : > { %vm5706_vm4 = vcmp.le.f32.partialorder %v3982_v3, %v4186_v7  ;;  %vm964_vm5 = vcmp.le.f32.partialorder %v3988_v1, %v4186_v7  ;;  %vm965_vm0 = vcmp.le.f32.partialorder %v3994_v8, %v4186_v7  ;;  %vm967_vm3 = vcmp.le.f32.partialorder %v4006_v39, %v4186_v7 }
 0x17f   : > { %vm968_vm2 = vcmp.le.f32.partialorder %v4012_v60, %v4186_v7  ;;  %vm969_vm1 = vcmp.le.f32.partialorder %v4018_v55, %v4186_v7  ;;  %vm971_vm6 = vcmp.le.f32.partialorder %v5741_v47, %v4186_v7  ;;  %vm972_vm7 = vcmp.le.f32.partialorder %v4038_v24, %v4186_v7 }
 0x180   : > { %vm973_vm8 = vcmp.le.f32.partialorder %v4046_v33, %v4186_v7  ;;  %vm975_vm9 = vcmp.le.f32.partialorder %v4060_v36, %v4186_v7  ;;  %vm976_vm10 = vcmp.le.f32.partialorder %v4066_v48, %v4186_v7  ;;  %vm977_vm11 = vcmp.le.f32.partialorder %v4072_v59, %v4186_v7 }
 0x181   : > { %v979_v13 = vmin.f32 %v4186_v7, 4.0  ;;  %v4217_v44 = vsel %vm965_vm0, 1e+30, %v3994_v8  ;;  %v4223_v50 = vsel %vm969_vm1, 1e+30, %v4018_v55  ;;  %vm966_vm12 = vcmp.le.f32.partialorder %v5742_v46, %v4186_v7 }
 0x182   : > { %v4231_v52 = vsel %vm973_vm8, 1e+30, %v4046_v33  ;;  %v4237_v43 = vsel %vm977_vm11, 1e+30, %v4072_v59  ;;  %v1017_v34 = vmin.f32 %v4217_v44, %v4223_v50  ;;  %vm970_vm13 = vcmp.le.f32.partialorder %v5743_v38, %v4186_v7 }
 0x183   : > { %v980_v19 = vsub.f32 0.0, %v979_v13  ;;  %vm974_vm14 = vcmp.le.f32.partialorder %v4052_v29, %v4186_v7  ;;  %vm978_vm15 = vcmp.le.f32.partialorder %v4080_v61, %v4186_v7  ;;  %v4251_v18 = vsel %vm5706_vm4, 1e+30, %v3982_v3 }
 0x184   : > { %v1021_v15 = vmin.f32 %v1017_v34, %v4231_v52  ;;  %v4258_v56 = vsel %vm964_vm5, 1e+30, %v3988_v1  ;;  %v4264_v4 = vsel %vm966_vm12, 1e+30, %v5742_v46  ;;  %v4270_v12 = vsel %vm967_vm3, 1e+30, %v4006_v39 }
 0x185   : > { %v981_v9 = vmul.f32 1.442695, %v980_v19  ;;  %v4276_v10 = vsel %vm968_vm2, 1e+30, %v4012_v60  ;;  %v4282_v11 = vsel %vm970_vm13, 1e+30, %v5743_v38  ;;  %v1015_v31 = vmin.f32 %v4251_v18, %v4270_v12 }
 0x186   : > { %v1025_v51 = vmin.f32 %v1021_v15, %v4237_v43  ;;  %v4291_v6 = vsel %vm971_vm6, 1e+30, %v5741_v47  ;;  %v4297_v23 = vsel %vm972_vm7, 1e+30, %v4038_v24  ;;  %v4303_v45 = vsel %vm974_vm14, 1e+30, %v4052_v29 }
 0x187   : > { %3048 = vpow2.f32 %v981_v9  ;;  %v4309_v62 = vsel %vm975_vm9, 1e+30, %v4060_v36  ;;  %v4315_v32 = vsel %vm976_vm10, 1e+30, %v4066_v48  ;;  %v4321_v37 = vsel %vm978_vm15, 1e+30, %v4080_v61 }
 0x188   : > { %v1016_v53 = vmin.f32 %v4258_v56, %v4276_v10  ;;  %v1018_v20 = vmin.f32 %v4264_v4, %v4282_v11  ;;  %v1019_v63 = vmin.f32 %v1015_v31, %v4291_v6  ;;  %vm5707_vm4 = vmmov 0  }
 0x189   : > { %v5744_v9 = vmov 0.0  }
 0x18a   : > { %v1020_v49 = vmin.f32 %v1016_v53, %v4297_v23  ;;  %v1022_v17 = vmin.f32 %v1018_v20, %v4303_v45  ;;  %v1023_v0 = vmin.f32 %v1019_v63, %v4309_v62  ;;  %2768 = vmatprep.mubr.msk.f32.mxu0 %vm5707_vm4, %v5744_v9  ;;  %2809 = vmatprep.mubr.msk.f32.mxu1 %vm5707_vm4, %v5744_v9 }
 0x18c   : > { %v1024_v57 = vmin.f32 %v1020_v49, %v4315_v32  ;;  %v1026_v30 = vmin.f32 %v1022_v17, %v4321_v37 }
 0x18e   : > { %v1027_v13 = vmin.f32 %v1023_v0, %v1024_v57  ;;  %v1028_v34 = vmin.f32 %v1025_v51, %v1026_v30 }
 0x190   : > { %v1029_v19 = vmin.f32 %v1027_v13, %v1028_v34 }
 0x192   : > { %v1030_v15 = vrot.slane %v1029_v19, 4 }
 0x194   : > { %v3049_v31 = vpop.eup %3048  ;;  %v1031_v53 = vmin.f32 %v1029_v19, %v1030_v15 }
 0x195   : > { %v4341_v20 = vsel %vm978_vm15, %v3049_v31, %v4100_v40  ;;  %v4347_v51 = vsel %vm977_vm11, %v3049_v31, %v4094_v26  ;;  %v4353_v63 = vsel %vm976_vm10, %v3049_v31, %v4106_v5  ;;  %v4359_v49 = vsel %vm975_vm9, %v3049_v31, %v4112_v35 }
 0x196   : > { %v1032_v61 = vrot.slane %v1031_v53, 2  ;;  %v4365_v59 = vsel %vm974_vm14, %v3049_v31, %v4118_v58  ;;  %v4371_v48 = vsel %vm973_vm8, %v3049_v31, %v4124_v2  ;;  %v4377_v36 = vsel %vm972_vm7, %v3049_v31, %v4130_v16 }
 0x197   : > { %v4383_v26 = vsel %vm971_vm6, %v3049_v31, %v4136_v41  ;;  %v4389_v29 = vsel %vm970_vm13, %v3049_v31, %v4142_v21  ;;  %v4395_v33 = vsel %vm969_vm1, %v3049_v31, %v4148_v54  ;;  %v4401_v24 = vsel %vm968_vm2, %v3049_v31, %v4154_v42 }
 0x198   : > { %v1033_v40 = vmin.f32 %v1031_v53, %v1032_v61  ;;  %v4407_v5 = vsel %vm967_vm3, %v3049_v31, %v4160_v25  ;;  %v4413_v55 = vsel %vm966_vm12, %v3049_v31, %v4166_v22  ;;  %v4419_v60 = vsel %vm965_vm0, %v3049_v31, %v4172_v28 }
 0x199   : > { %v4425_v35 = vsel %vm964_vm5, %v3049_v31, %v4178_v27  ;;  %vm5745_vm3 = vcmp.le.f32.partialorder %v3982_v3, %v4186_v7 }
 0x19a   : > { %v4431_v39 = vsel %vm5745_vm3, %v3049_v31, %v4184_v14  ;;  %v1034_v58 = vrot.slane %v1033_v40, 1 }
 0x19c   : > { %v4433_v2 = vmin.f32 %v1033_v40, %v1034_v58 }
 0x19e   : > { %vm1036_vm2 = vcmp.le.f32.partialorder %v4251_v18, %v4433_v2  ;;  %vm1037_vm0 = vcmp.le.f32.partialorder %v4258_v56, %v4433_v2  ;;  %vm1038_vm1 = vcmp.le.f32.partialorder %v4217_v44, %v4433_v2  ;;  %vm1039_vm5 = vcmp.le.f32.partialorder %v4264_v4, %v4433_v2 }
 0x19f   : > { %vm1040_vm6 = vcmp.le.f32.partialorder %v4270_v12, %v4433_v2  ;;  %vm1041_vm7 = vcmp.le.f32.partialorder %v4276_v10, %v4433_v2  ;;  %vm1042_vm8 = vcmp.le.f32.partialorder %v4223_v50, %v4433_v2  ;;  %vm1043_vm9 = vcmp.le.f32.partialorder %v4282_v11, %v4433_v2 }
 0x1a0   : > { %vm1044_vm10 = vcmp.le.f32.partialorder %v4291_v6, %v4433_v2  ;;  %vm1045_vm11 = vcmp.le.f32.partialorder %v4297_v23, %v4433_v2  ;;  %vm1046_vm12 = vcmp.le.f32.partialorder %v4231_v52, %v4433_v2  ;;  %vm1047_vm13 = vcmp.le.f32.partialorder %v4303_v45, %v4433_v2 }
 0x1a1   : > { %vm1048_vm14 = vcmp.le.f32.partialorder %v4309_v62, %v4433_v2  ;;  %vm1049_vm15 = vcmp.le.f32.partialorder %v4315_v32, %v4433_v2  ;;  %vm1050_vm3 = vcmp.le.f32.partialorder %v4237_v43, %v4433_v2  ;;  %vm1051_vm4 = vcmp.le.f32.partialorder %v4321_v37, %v4433_v2 }
 0x1a2   : > { %v1052_v3 = vmin.f32 %v4433_v2, 4.0  ;;  %v4472_v1 = vsel %vm1036_vm2, 1e+30, %v4251_v18  ;;  %v4478_v8 = vsel %vm1037_vm0, 1e+30, %v4258_v56 }
 0x1a3   : > { %v4484_v16 = vsel %vm1038_vm1, 1e+30, %v4217_v44  ;;  %v4490_v41 = vsel %vm1039_vm5, 1e+30, %v4264_v4  ;;  %v4496_v21 = vsel %vm1040_vm6, 1e+30, %v4270_v12 }
 0x1a4   : > { %v1053_v54 = vsub.f32 0.0, %v1052_v3  ;;  %v4502_v42 = vsel %vm1041_vm7, 1e+30, %v4276_v10  ;;  %v4508_v25 = vsel %vm1042_vm8, 1e+30, %v4223_v50  ;;  %v1088_v22 = vmin.f32 %v4472_v1, %v4496_v21 }
 0x1a5   : > { %5746 = vst [vmem:[#allocation13_spill] sm:$0xff] %v4508_v25  ;;  %v4516_v28 = vsel %vm1043_vm9, 1e+30, %v4282_v11  ;;  %v4522_v27 = vsel %vm1044_vm10, 1e+30, %v4291_v6  ;;  %v1089_v7 = vmin.f32 %v4478_v8, %v4502_v42  ;;  %v1090_v17 = vmin.f32 %v4484_v16, %v4508_v25 }
 0x1a6   : > { %5747 = vst [vmem:[#allocation11_spill] sm:$0xff] %v4516_v28  ;;  %5748 = vst [vmem:[#allocation12_spill] sm:$0xff] %v4522_v27  ;;  %v4528_v14 = vsel %vm1045_vm11, 1e+30, %v4297_v23  ;;  %v1054_v47 = vmul.f32 1.442695, %v1053_v54  ;;  %v1091_v13 = vmin.f32 %v4490_v41, %v4516_v28  ;;  %v1092_v19 = vmin.f32 %v1088_v22, %v4522_v27 }
 0x1a7   : > { %v4536_v46 = vsel %vm1046_vm12, 1e+30, %v4231_v52  ;;  %v4542_v38 = vsel %vm1047_vm13, 1e+30, %v4303_v45  ;;  %v4550_v0 = vsel %vm1048_vm14, 1e+30, %v4309_v62  ;;  %v1093_v15 = vmin.f32 %v1089_v7, %v4528_v14 }
 0x1a8   : > { %v4556_v57 = vsel %vm1049_vm15, 1e+30, %v4315_v32  ;;  %v4562_v30 = vsel %vm1050_vm3, 1e+30, %v4237_v43  ;;  %3050 = vpow2.f32 %v1054_v47  ;;  %v4570_v34 = vsel %vm1051_vm4, 1e+30, %v4321_v37 }
 0x1a9   : > { %v1094_v31 = vmin.f32 %v1090_v17, %v4536_v46  ;;  %v1095_v53 = vmin.f32 %v1091_v13, %v4542_v38  ;;  %v1096_v61 = vmin.f32 %v1092_v19, %v4550_v0  ;;  %v1097_v40 = vmin.f32 %v1093_v15, %v4556_v57 }
 0x1ab   : > { %v1098_v58 = vmin.f32 %v1094_v31, %v4562_v30  ;;  %v1099_v3 = vmin.f32 %v1095_v53, %v4570_v34  ;;  %v1100_v54 = vmin.f32 %v1096_v61, %v1097_v40 }
 0x1ac   : > { %v5749_v44 = vld [vmem:[#allocation13_spill] sm:$0xff] }
 0x1ad   : > { %v1101_v47 = vmin.f32 %v1098_v58, %v1099_v3  ;;  %v5750_v18 = vld [vmem:[#allocation11_spill] sm:$0xff]  ;;  %v5751_v56 = vld [vmem:[#allocation12_spill] sm:$0xff] }
 0x1af   : > { %v1102_v9 = vmin.f32 %v1100_v54, %v1101_v47 }
 0x1b1   : > { %v1103_v28 = vrot.slane %v1102_v9, 4 }
 0x1b3   : > { %v1104_v25 = vmin.f32 %v1102_v9, %v1103_v28 }
 0x1b5   : > { %v3051_v22 = vpop.eup %3050  ;;  %v1105_v27 = vrot.slane %v1104_v25, 2 }
 0x1b6   : > { %v4584_v7 = vsel %vm1051_vm4, %v3051_v22, %v4341_v20  ;;  %v4590_v17 = vsel %vm1050_vm3, %v3051_v22, %v4347_v51  ;;  %v4596_v13 = vsel %vm1049_vm15, %v3051_v22, %v4353_v63  ;;  %v4602_v9 = vsel %vm1048_vm14, %v3051_v22, %v4359_v49 }
 0x1b7   : > { %v1106_v37 = vmin.f32 %v1104_v25, %v1105_v27  ;;  %v4608_v43 = vsel %vm1047_vm13, %v3051_v22, %v4365_v59  ;;  %v4614_v32 = vsel %vm1046_vm12, %v3051_v22, %v4371_v48  ;;  %v4620_v62 = vsel %vm1045_vm11, %v3051_v22, %v4377_v36 }
 0x1b8   : > { %v4626_v20 = vsel %vm1044_vm10, %v3051_v22, %v4383_v26  ;;  %v4632_v45 = vsel %vm1043_vm9, %v3051_v22, %v4389_v29  ;;  %v4638_v52 = vsel %vm1042_vm8, %v3051_v22, %v4395_v33  ;;  %v4644_v23 = vsel %vm1041_vm7, %v3051_v22, %v4401_v24 }
 0x1b9   : > { %v1107_v6 = vrot.slane %v1106_v37, 1  ;;  %v4650_v11 = vsel %vm1040_vm6, %v3051_v22, %v4407_v5  ;;  %v4656_v50 = vsel %vm1039_vm5, %v3051_v22, %v4413_v55  ;;  %v4662_v10 = vsel %vm1038_vm1, %v3051_v22, %v4419_v60 }
 0x1ba   : > { %v4668_v51 = vsel %vm1037_vm0, %v3051_v22, %v4425_v35  ;;  %v4674_v12 = vsel %vm1036_vm2, %v3051_v22, %v4431_v39 }
 0x1bb   : > { %v4676_v4 = vmin.f32 %v1106_v37, %v1107_v6 }
 0x1bd   : > { %vm1109_vm4 = vcmp.le.f32.partialorder %v4472_v1, %v4676_v4  ;;  %vm1110_vm1 = vcmp.le.f32.partialorder %v4478_v8, %v4676_v4  ;;  %vm1111_vm5 = vcmp.le.f32.partialorder %v4484_v16, %v4676_v4  ;;  %vm1112_vm0 = vcmp.le.f32.partialorder %v4490_v41, %v4676_v4 }
 0x1be   : > { %vm1113_vm6 = vcmp.le.f32.partialorder %v4496_v21, %v4676_v4  ;;  %vm1114_vm2 = vcmp.le.f32.partialorder %v4502_v42, %v4676_v4  ;;  %vm1115_vm7 = vcmp.le.f32.partialorder %v5749_v44, %v4676_v4  ;;  %vm1116_vm8 = vcmp.le.f32.partialorder %v5750_v18, %v4676_v4 }
 0x1bf   : > { %vm1117_vm9 = vcmp.le.f32.partialorder %v5751_v56, %v4676_v4  ;;  %vm1118_vm10 = vcmp.le.f32.partialorder %v4528_v14, %v4676_v4  ;;  %vm1119_vm11 = vcmp.le.f32.partialorder %v4536_v46, %v4676_v4  ;;  %vm1120_vm12 = vcmp.le.f32.partialorder %v4542_v38, %v4676_v4 }
 0x1c0   : > { %vm1121_vm13 = vcmp.le.f32.partialorder %v4550_v0, %v4676_v4  ;;  %vm1122_vm14 = vcmp.le.f32.partialorder %v4556_v57, %v4676_v4  ;;  %vm1123_vm15 = vcmp.le.f32.partialorder %v4562_v30, %v4676_v4  ;;  %vm1124_vm3 = vcmp.le.f32.partialorder %v4570_v34, %v4676_v4 }
 0x1c1   : > { %v1125_v63 = vmin.f32 %v4676_v4, 4.0  ;;  %v4715_v49 = vsel %vm1109_vm4, 1e+30, %v4472_v1  ;;  %v4721_v59 = vsel %vm1110_vm1, 1e+30, %v4478_v8 }
 0x1c2   : > { %5752 = vst [vmem:[#allocation13_spill] sm:$0xff] %v4715_v49  ;;  %5753 = vst [vmem:[#allocation11_spill] sm:$0xff] %v4721_v59  ;;  %v4727_v48 = vsel %vm1111_vm5, 1e+30, %v4484_v16  ;;  %v4733_v36 = vsel %vm1112_vm0, 1e+30, %v4490_v41 }
 0x1c3   : > { %5754 = vst [vmem:[#allocation12_spill] sm:$0xff] %v4727_v48  ;;  %5755 = vst [vmem:[#allocation14_spill] sm:$0xff] %v4733_v36  ;;  %v4739_v26 = vsel %vm1113_vm6, 1e+30, %v4496_v21  ;;  %v1126_v29 = vsub.f32 0.0, %v1125_v63 }
 0x1c4   : > { %v4745_v33 = vsel %vm1114_vm2, 1e+30, %v4502_v42  ;;  %v4751_v24 = vsel %vm1115_vm7, 1e+30, %v5749_v44  ;;  %v1161_v5 = vmin.f32 %v4715_v49, %v4739_v26  ;;  %v4759_v55 = vsel %vm1116_vm8, 1e+30, %v5750_v18 }
 0x1c5   : > { %v4765_v60 = vsel %vm1117_vm9, 1e+30, %v5751_v56  ;;  %v4771_v35 = vsel %vm1118_vm10, 1e+30, %v4528_v14  ;;  %v1162_v39 = vmin.f32 %v4721_v59, %v4745_v33  ;;  %v1127_v2 = vmul.f32 1.442695, %v1126_v29 }
 0x1c6   : > { %v4779_v25 = vsel %vm1119_vm11, 1e+30, %v4536_v46  ;;  %v4785_v28 = vsel %vm1120_vm12, 1e+30, %v4542_v38  ;;  %v1163_v27 = vmin.f32 %v4727_v48, %v4751_v24  ;;  %v4793_v19 = vsel %vm1121_vm13, 1e+30, %v4550_v0 }
 0x1c7   : > { %v4799_v15 = vsel %vm1122_vm14, 1e+30, %v4556_v57  ;;  %v1159_v31 = vsel %vm1123_vm15, 1e+30, %v4562_v30  ;;  %v1164_v53 = vmin.f32 %v4733_v36, %v4759_v55  ;;  %3052 = vpow2.f32 %v1127_v2 }
 0x1c8   : > { %v1160_v61 = vsel %vm1124_vm3, 1e+30, %v4570_v34  ;;  %v1165_v40 = vmin.f32 %v1161_v5, %v4765_v60  ;;  %v1166_v58 = vmin.f32 %v1162_v39, %v4771_v35  ;;  %v1167_v3 = vmin.f32 %v1163_v27, %v4779_v25 }
 0x1c9   : > { %v1168_v54 = vmin.f32 %v1164_v53, %v4785_v28 }
 0x1ca   : > { %v1169_v47 = vmin.f32 %v1165_v40, %v4793_v19  ;;  %v1170_v22 = vmin.f32 %v1166_v58, %v4799_v15  ;;  %v1171_v37 = vmin.f32 %v1167_v3, %v1159_v31  ;;  %v5756_v8 = vld [vmem:[#allocation14_spill] sm:$0xff] }
 0x1cb   : > { %v1172_v6 = vmin.f32 %v1168_v54, %v1160_v61 }
 0x1cc   : > { %v1173_v63 = vmin.f32 %v1169_v47, %v1170_v22 }
 0x1cd   : > { %v1174_v29 = vmin.f32 %v1171_v37, %v1172_v6 }
 0x1cf   : > { %v1175_v2 = vmin.f32 %v1173_v63, %v1174_v29 }
 0x1d1   : > { %v1176_v49 = vrot.slane %v1175_v2, 4 }
 0x1d3   : > { %v1177_v59 = vmin.f32 %v1175_v2, %v1176_v49 }
 0x1d4   : > { %v3053_v48 = vpop.eup %3052 }
 0x1d5   : > { %v1178_v36 = vrot.slane %v1177_v59, 2  ;;  %v1144_v5 = vsel %vm1124_vm3, %v3053_v48, %v4584_v7  ;;  %v1143_v39 = vsel %vm1123_vm15, %v3053_v48, %v4590_v17  ;;  %v1142_v27 = vsel %vm1122_vm14, %v3053_v48, %v4596_v13 }
 0x1d6   : > { %v1141_v49 = vsel %vm1121_vm13, %v3053_v48, %v4602_v9  ;;  %v1140_v34 = vsel %vm1120_vm12, %v3053_v48, %v4608_v43  ;;  %v1139_v30 = vsel %vm1119_vm11, %v3053_v48, %v4614_v32  ;;  %v1138_v57 = vsel %vm1118_vm10, %v3053_v48, %v4620_v62  ;;  %v5757_v43 = vld [vmem:[#allocation12_spill] sm:$0xff]  ;;  %v5758_v62 = vld [vmem:[#allocation11_spill] sm:$0xff] }
 0x1d7   : > { %v1179_v53 = vmin.f32 %v1177_v59, %v1178_v36  ;;  %v1137_v0 = vsel %vm1117_vm9, %v3053_v48, %v4626_v20  ;;  %v1136_v38 = vsel %vm1116_vm8, %v3053_v48, %v4632_v45  ;;  %v1135_v46 = vsel %vm1115_vm7, %v3053_v48, %v4638_v52  ;;  %v5759_v20 = vld [vmem:[#allocation13_spill] sm:$0xff] }
 0x1d8   : > { %v4861_v14 = vsel %vm1114_vm2, %v3053_v48, %v4644_v23  ;;  %v4867_v17 = vsel %vm1113_vm6, %v3053_v48, %v4650_v11  ;;  %v4873_v13 = vsel %vm1112_vm0, %v3053_v48, %v4656_v50  ;;  %v4879_v42 = vsel %vm1111_vm5, %v3053_v48, %v4662_v10 }
 0x1d9   : > { %v1180_v7 = vrot.slane %v1179_v53, 1  ;;  %v4885_v9 = vsel %vm1110_vm1, %v3053_v48, %v4668_v51  ;;  %v4891_v21 = vsel %vm1109_vm4, %v3053_v48, %v4674_v12 }
 0x1db   : > { %v4893_v41 = vmin.f32 %v1179_v53, %v1180_v7 }
 0x1dd   : > { %vm1197_vm0 = vcmp.le.f32.partialorder %v1160_v61, %v4893_v41  ;;  %v1198_v16 = vmin.f32 %v4893_v41, 4.0  ;;  %vm1196_vm5 = vcmp.le.f32.partialorder %v1159_v31, %v4893_v41  ;;  %vm1195_vm6 = vcmp.le.f32.partialorder %v4799_v15, %v4893_v41 }
 0x1de   : > { %vm1194_vm1 = vcmp.le.f32.partialorder %v4793_v19, %v4893_v41  ;;  %vm1193_vm2 = vcmp.le.f32.partialorder %v4785_v28, %v4893_v41  ;;  %vm1192_vm4 = vcmp.le.f32.partialorder %v4779_v25, %v4893_v41  ;;  %vm1191_vm7 = vcmp.le.f32.partialorder %v4771_v35, %v4893_v41 }
 0x1df   : > { %v1199_v1 = vsub.f32 0.0, %v1198_v16  ;;  %vm1190_vm8 = vcmp.le.f32.partialorder %v4765_v60, %v4893_v41  ;;  %vm1189_vm9 = vcmp.le.f32.partialorder %v4759_v55, %v4893_v41  ;;  %vm1188_vm10 = vcmp.le.f32.partialorder %v4751_v24, %v4893_v41 }
 0x1e0   : > { %vm1187_vm11 = vcmp.le.f32.partialorder %v4745_v33, %v4893_v41  ;;  %vm1186_vm12 = vcmp.le.f32.partialorder %v4739_v26, %v4893_v41  ;;  %vm1185_vm13 = vcmp.le.f32.partialorder %v5756_v8, %v4893_v41  ;;  %vm1184_vm14 = vcmp.le.f32.partialorder %v5757_v43, %v4893_v41 }
 0x1e1   : > { %v1200_v32 = vmul.f32 1.442695, %v1199_v1  ;;  %vm1183_vm15 = vcmp.le.f32.partialorder %v5758_v62, %v4893_v41  ;;  %vm1182_vm3 = vcmp.le.f32.partialorder %v5759_v20, %v4893_v41  ;;  %v5760_v28 = vmov 0.0  }
 0x1e3   : > { %3054 = vpow2.f32 %v1200_v32 }
 0x1f0   : > { %v4926_v45 = vpop.eup %3054 }
 0x1f1   : > { %v1217_v52 = vsel %vm1197_vm0, %v4926_v45, %v1144_v5  ;;  %v1216_v23 = vsel %vm1196_vm5, %v4926_v45, %v1143_v39  ;;  %v1215_v11 = vsel %vm1195_vm6, %v4926_v45, %v1142_v27  ;;  %v1214_v50 = vsel %vm1194_vm1, %v4926_v45, %v1141_v49 }
 0x1f2   : > { %v4942_v10 = vand.u32 4294901760, %v1217_v52  ;;  %v4944_v51 = vand.u32 4294901760, %v1216_v23  ;;  %v4946_v12 = vand.u32 4294901760, %v1215_v11  ;;  %v4948_v4 = vand.u32 4294901760, %v1214_v50 }
 0x1f3   : > { %v1213_v44 = vsel %vm1193_vm2, %v4926_v45, %v1140_v34  ;;  %v1212_v18 = vsel %vm1192_vm4, %v4926_v45, %v1139_v30  ;;  %v1211_v56 = vsel %vm1191_vm7, %v4926_v45, %v1138_v57  ;;  %v1210_v59 = vsel %vm1190_vm8, %v4926_v45, %v1137_v0  ;;  %v1218_v0 = vld [vmem:[%s5683_s2] sm:$0xff] }
 0x1f4   : > { %2737 = vmatpush3.msra.mxu0 %v4942_v10  ;;  %v4967_v48 = vand.u32 4294901760, %v1213_v44  ;;  %v4970_v36 = vsub.f32 %v1217_v52, %v4942_v10  ;;  %v4973_v25 = vsub.f32 %v1216_v23, %v4944_v51  ;;  %v4976_v19 = vand.u32 4294901760, %v1212_v18 }
 0x1f5   : > { %2738 = vmatprep.subr.mxu0 %v5760_v28  ;;  %v4979_v35 = vsub.f32 %v1215_v11, %v4946_v12  ;;  %v4982_v60 = vsub.f32 %v1214_v50, %v4948_v4  ;;  %v1209_v61 = vsel %vm1189_vm9, %v4926_v45, %v1136_v38  ;;  %v4995_v58 = vand.u32 4294901760, %v1211_v56 }
 0x1f6   : > { %2739 = vmatpush3.msra.mxu0 %v4944_v51  ;;  %v1335_v15 = vand.u32 4294901760, %v4970_v36  ;;  %v1342_v31 = vand.u32 4294901760, %v4973_v25  ;;  %v4992_v40 = vsub.f32 %v1213_v44, %v4967_v48  ;;  %v1208_v47 = vsel %vm1188_vm10, %v4926_v45, %v1135_v46 }
 0x1f7   : > { %2740 = vmatprep.subr.mxu0 %v5760_v28  ;;  %v1349_v3 = vand.u32 4294901760, %v4979_v35  ;;  %v1356_v54 = vand.u32 4294901760, %v4982_v60  ;;  %v5010_v37 = vand.u32 4294901760, %v1210_v59  ;;  %v5015_v63 = vsub.f32 %v1212_v18, %v4976_v19 }
 0x1f8   : > { %2741 = vmatpush3.msra.mxu0 %v4946_v12  ;;  %v1336_v55 = vsub.f32 %v4970_v36, %v1335_v15  ;;  %v1343_v22 = vsub.f32 %v4973_v25, %v1342_v31  ;;  %v1363_v6 = vand.u32 4294901760, %v4992_v40  ;;  %v1207_v24 = vsel %vm1187_vm11, %v4926_v45, %v4861_v14 }
 0x1f9   : > { %2742 = vmatprep.subr.mxu0 %v5760_v28  ;;  %v1350_v2 = vsub.f32 %v4979_v35, %v1349_v3  ;;  %v5026_v5 = vand.u32 4294901760, %v1209_v61  ;;  %v1357_v27 = vsub.f32 %v4982_v60, %v1356_v54  ;;  %v5032_v49 = vand.u32 4294901760, %v1208_v47 }
 0x1fa   : > { %2743 = vmatpush3.msra.mxu0 %v4948_v4  ;;  %v1337_v29 = vand.u32 4294901760, %v1336_v55  ;;  %v1344_v39 = vand.u32 4294901760, %v1343_v22  ;;  %v5035_v33 = vsub.f32 %v1211_v56, %v4995_v58  ;;  %v1370_v53 = vand.u32 4294901760, %v5015_v63 }
 0x1fb   : > { %2744 = vmatprep.subr.mxu0 %v5760_v28  ;;  %v1206_v34 = vsel %vm1186_vm12, %v4926_v45, %v4867_v17  ;;  %v5045_v30 = vsub.f32 %v1210_v59, %v5010_v37  ;;  %v1205_v57 = vsel %vm1185_vm13, %v4926_v45, %v4873_v13  ;;  %v1364_v26 = vsub.f32 %v4992_v40, %v1363_v6 }
 0x1fc   : > { %2745 = vmatpush3.msra.mxu0 %v4967_v48  ;;  %2778 = vmatpush3.msra.mxu1 %v1337_v29  ;;  %v5060_v38 = vand.u32 4294901760, %v1207_v24  ;;  %v1351_v46 = vand.u32 4294901760, %v1350_v2  ;;  %v1377_v14 = vand.u32 4294901760, %v5035_v33  ;;  %v5065_v7 = vsub.f32 %v1209_v61, %v5026_v5 }
 0x1fd   : > { %2746 = vmatprep.subr.mxu0 %v5760_v28  ;;  %2779 = vmatprep.subr.mxu1 %v5760_v28  ;;  %v1204_v17 = vsel %vm1184_vm14, %v4926_v45, %v4879_v42  ;;  %v1384_v13 = vand.u32 4294901760, %v5045_v30  ;;  %v1203_v16 = vsel %vm1183_vm15, %v4926_v45, %v4885_v9  ;;  %v5080_v1 = vand.u32 4294901760, %v1218_v0 }
 0x1fe   : > { %2747 = vmatpush3.msra.mxu0 %v4976_v19  ;;  %2780 = vmatpush3.msra.mxu1 %v1344_v39  ;;  %v1358_v8 = vand.u32 4294901760, %v1357_v27  ;;  %v1371_v42 = vsub.f32 %v5015_v63, %v1370_v53  ;;  %v5086_v43 = vand.u32 4294901760, %v1206_v34  ;;  %v5089_v32 = vsub.f32 %v1208_v47, %v5032_v49 }
 0x1ff   : > { %2748 = vmatprep.subr.mxu0 %v5760_v28  ;;  %2781 = vmatprep.subr.mxu1 %v5760_v28  ;;  %v1365_v9 = vand.u32 4294901760, %v1364_v26  ;;  %v1202_v62 = vsel %vm1182_vm3, %v4926_v45, %v4891_v21  ;;  %v1378_v52 = vsub.f32 %v5035_v33, %v1377_v14  ;;  %v5102_v23 = vand.u32 4294901760, %v1205_v57 }
 0x200   : > { %2749 = vmatpush3.msra.mxu0 %v4995_v58  ;;  %2782 = vmatpush3.msra.mxu1 %v1351_v46  ;;  %v1391_v11 = vand.u32 4294901760, %v5065_v7  ;;  %v5106_v50 = vsub.f32 %v1207_v24, %v5060_v38  ;;  %v1385_v21 = vsub.f32 %v5045_v30, %v1384_v13  ;;  %v5114_v41 = vsub.f32 %v1218_v0, %v5080_v1 }
 0x201   : > { %2750 = vmatprep.subr.mxu0 %v5760_v28  ;;  %2783 = vmatprep.subr.mxu1 %v5760_v28  ;;  %v1372_v20 = vand.u32 4294901760, %v1371_v42  ;;  %v5117_v45 = vand.u32 4294901760, %v1204_v17  ;;  %v1398_v44 = vand.u32 4294901760, %v5089_v32  ;;  %v5121_v18 = vsub.f32 %v1206_v34, %v5086_v43 }
 0x202   : > { %2751 = vmatpush3.msra.mxu0 %v5010_v37  ;;  %2784 = vmatpush3.msra.mxu1 %v1358_v8  ;;  %v5125_v56 = vand.u32 4294901760, %v1203_v16  ;;  %v1379_v59 = vand.u32 4294901760, %v1378_v52  ;;  %v1392_v61 = vsub.f32 %v5065_v7, %v1391_v11  ;;  %v1405_v47 = vand.u32 4294901760, %v5106_v50 }
 0x203   : > { %2752 = vmatprep.subr.mxu0 %v5760_v28  ;;  %2785 = vmatprep.subr.mxu1 %v5760_v28  ;;  %v5133_v55 = vsub.f32 %v1205_v57, %v5102_v23  ;;  %v1386_v22 = vand.u32 4294901760, %v1385_v21  ;;  %v1304_v24 = vand.u32 4294901760, %v5114_v41  ;;  %v1399_v29 = vsub.f32 %v5089_v32, %v1398_v44 }
 0x204   : > { %2753 = vmatpush3.msra.mxu0 %v5026_v5  ;;  %2786 = vmatpush3.msra.mxu1 %v1365_v9  ;;  %v5142_v2 = vand.u32 4294901760, %v1202_v62  ;;  %v1412_v39 = vand.u32 4294901760, %v5121_v18  ;;  %v5146_v27 = vsub.f32 %v1204_v17, %v5117_v45  ;;  %v1393_v34 = vand.u32 4294901760, %v1392_v61 }
 0x205   : > { %2754 = vmatprep.subr.mxu0 %v5760_v28  ;;  %2787 = vmatprep.subr.mxu1 %v5760_v28  ;;  %v1406_v57 = vsub.f32 %v5106_v50, %v1405_v47  ;;  %v1419_v0 = vand.u32 4294901760, %v5133_v55  ;;  %v5156_v26 = vsub.f32 %v1203_v16, %v5125_v56  ;;  %v1305_v46 = vsub.f32 %v5114_v41, %v1304_v24 }
 0x206   : > { %2755 = vmatpush3.msra.mxu0 %v5032_v49  ;;  %2788 = vmatpush3.msra.mxu1 %v1372_v20  ;;  %v1400_v17 = vand.u32 4294901760, %v1399_v29  ;;  %v1413_v8 = vsub.f32 %v5121_v18, %v1412_v39  ;;  %v1426_v42 = vand.u32 4294901760, %v5146_v27  ;;  %v5169_v16 = vsub.f32 %v1202_v62, %v5142_v2 }
 0x207   : > { %2756 = vmatprep.subr.mxu0 %v5760_v28  ;;  %2789 = vmatprep.subr.mxu1 %v5760_v28  ;;  %v1407_v9 = vand.u32 4294901760, %v1406_v57  ;;  %v1420_v52 = vsub.f32 %v5133_v55, %v1419_v0  ;;  %v1433_v21 = vand.u32 4294901760, %v5156_v26  ;;  %v1306_v20 = vand.u32 4294901760, %v1305_v46  ;;  %v1219_v46 = vld [vmem:[%s5683_s2 + $0x8] sm:$0xff] }
 0x208   : > { %2757 = vmatpush3.msra.mxu0 %v5060_v38  ;;  %2790 = vmatpush3.msra.mxu1 %v1379_v59  ;;  %v1414_v62 = vand.u32 4294901760, %v1413_v8  ;;  %v1427_v59 = vsub.f32 %v5146_v27, %v1426_v42  ;;  %v1440_v61 = vand.u32 4294901760, %v5169_v16  ;;  %vm5761_vm0 = vmmov 0  }
 0x209   : > { %2758 = vmatprep.subr.mxu0 %v5760_v28  ;;  %2791 = vmatprep.subr.mxu1 %v5760_v28  ;;  %v1434_v29 = vsub.f32 %v5156_v26, %v1433_v21  ;;  %vm2000_vm1 = vcmask 1040384   ;;  %vm2002_vm2 = vcmask 1041408   ;;  %vm2257_vm4 = vcmask 1042432  }
 0x20a   : > { %2759 = vmatpush3.msra.mxu0 %v5086_v43  ;;  %2792 = vmatpush3.msra.mxu1 %v1386_v22  ;;  %v1421_v22 = vand.u32 4294901760, %v1420_v52  ;;  %v1441_v57 = vsub.f32 %v5169_v16, %v1440_v61  ;;  %v1220_v52 = vld [vmem:[%s5683_s2 + $0x10] sm:$0x1]  ;;  %vm2259_vm7 = vcmask 1043456   ;;  %vm2261_vm8 = vcmask 1044480  }
 0x20b   : > { %2760 = vmatprep.subr.mxu0 %v5760_v28  ;;  %2793 = vmatprep.subr.mxu1 %v5760_v28  ;;  %vm2263_vm9 = vcmask 1045504   ;;  %vm2265_vm10 = vcmask 1046528  }
 0x20c   : > { %2761 = vmatpush3.msra.mxu0 %v5102_v23  ;;  %2794 = vmatpush3.msra.mxu1 %v1393_v34  ;;  %v1428_v34 = vand.u32 4294901760, %v1427_v59  ;;  %v1442_v8 = vand.u32 4294901760, %v1441_v57 }
 0x20d   : > { %2762 = vmatprep.subr.mxu0 %v5760_v28  ;;  %2795 = vmatprep.subr.mxu1 %v5760_v28 }
 0x20e   : > { %2763 = vmatpush3.msra.mxu0 %v5117_v45  ;;  %2796 = vmatpush3.msra.mxu1 %v1400_v17  ;;  %v1435_v17 = vand.u32 4294901760, %v1434_v29 }
 0x20f   : > { %2764 = vmatprep.subr.mxu0 %v5760_v28  ;;  %2797 = vmatprep.subr.mxu1 %v5760_v28 }
 0x210   : > { %2765 = vmatpush3.msra.mxu0 %v5125_v56  ;;  %2798 = vmatpush3.msra.mxu1 %v1407_v9  ;;  %v5205_v9 = vand.u32 4294901760, %v1219_v46 }
 0x211   : > { %2766 = vmatprep.subr.mxu0 %v5760_v28  ;;  %2799 = vmatprep.subr.mxu1 %v5760_v28 }
 0x212   : > { %2767 = vmatpush3.msra.mxu0 %v5142_v2  ;;  %2800 = vmatpush3.msra.mxu1 %v1414_v62  ;;  %v5218_v62 = vsub.f32 %v1219_v46, %v5205_v9 }
 0x213   : > { %2801 = vmatprep.subr.mxu1 %v5760_v28  ;;  %2818 = vmatprep.subr.mxu0 %v5760_v28 }
 0x214   : > { %2769 = vmatmul.mubr.f32.vlgmr.msra.gmra.mxu0 %v1306_v20  ;;  %2802 = vmatpush3.msra.mxu1 %v1421_v22  ;;  %v5222_v20 = vand.u32 4294901760, %v1220_v52  ;;  %v1314_v59 = vand.u32 4294901760, %v5218_v62 }
 0x215   : > { %2819 = vmatpush3.msra.mxu0 %v4970_v36  ;;  %2803 = vmatprep.subr.mxu1 %v5760_v28  ;;  %v2005_v36 = vld [vmem:[%s353_s23] sm:$0xf]  ;;  %s2616_s23 = sshll.u32 (%p3245_p5), %s3228_s9, 3 }
 0x216   : > { %2820 = vmatprep.subr.mxu0 %v5760_v28  ;;  %2804 = vmatpush3.msra.mxu1 %v1428_v34  ;;  %v5234_v22 = vsub.f32 %v1220_v52, %v5222_v20  ;;  %v1315_v29 = vsub.f32 %v5218_v62, %v1314_v59  ;;  %s2328_s13 = scalar_lea.vmem (%p3245_p5), %s5686_s5, %s2616_s23 }
 0x217   : > { %2821 = vmatpush3.msra.mxu0 %v4973_v25  ;;  %2805 = vmatprep.subr.mxu1 %v5760_v28  ;;  %v2006_v25 = vmul.f32 %v2005_v36, %v2005_v36 }
 0x218   : > { %2822 = vmatprep.subr.mxu0 %v5760_v28  ;;  %2806 = vmatpush3.msra.mxu1 %v1435_v17  ;;  %v1324_v34 = vand.u32 4294901760, %v5234_v22  ;;  %v1316_v57 = vand.u32 4294901760, %v1315_v29 }
 0x219   : > { %2823 = vmatpush3.msra.mxu0 %v4979_v35  ;;  %2807 = vmatprep.subr.mxu1 %v5760_v28 }
 0x21a   : > { %2824 = vmatprep.subr.mxu0 %v5760_v28  ;;  %2808 = vmatpush3.msra.mxu1 %v1442_v8  ;;  %v1325_v46 = vsub.f32 %v5234_v22, %v1324_v34 }
 0x21b   : > { %2825 = vmatpush3.msra.mxu0 %v4982_v60  ;;  %2810 = vmatmul.mubr.f32.vlgmr.msra.gmra.mxu1 %v5080_v1 }
 0x21c   : > { %2826 = vmatprep.subr.mxu0 %v5760_v28  ;;  %2859 = vmatprep.subr.mxu1 %v5760_v28  ;;  %v1326_v17 = vand.u32 4294901760, %v1325_v46 }
 0x21d   : > { %2827 = vmatpush3.msra.mxu0 %v4992_v40  ;;  %2860 = vmatpush3.msra.mxu1 %v4942_v10  ;;  %v2014_v40 = vrot.slane %v2006_v25, 3 }
 0x21e   : > { %2828 = vmatprep.subr.mxu0 %v5760_v28  ;;  %2861 = vmatprep.subr.mxu1 %v5760_v28 }
 0x21f   : > { %2829 = vmatpush3.msra.mxu0 %v5015_v63  ;;  %2862 = vmatpush3.msra.mxu1 %v4944_v51 }
 0x220   : > { %2830 = vmatprep.subr.mxu0 %v5760_v28  ;;  %2863 = vmatprep.subr.mxu1 %v5760_v28 }
 0x221   : > { %2831 = vmatpush3.msra.mxu0 %v5035_v33  ;;  %2864 = vmatpush3.msra.mxu1 %v4946_v12 }
 0x222   : > { %2832 = vmatprep.subr.mxu0 %v5760_v28  ;;  %2865 = vmatprep.subr.mxu1 %v5760_v28 }
 0x223   : > { %2833 = vmatpush3.msra.mxu0 %v5045_v30  ;;  %2866 = vmatpush3.msra.mxu1 %v4948_v4 }
 0x224   : > { %2834 = vmatprep.subr.mxu0 %v5760_v28  ;;  %2867 = vmatprep.subr.mxu1 %v5760_v28 }
 0x225   : > { %2835 = vmatpush3.msra.mxu0 %v5065_v7  ;;  %2868 = vmatpush3.msra.mxu1 %v4967_v48 }
 0x226   : > { %2836 = vmatprep.subr.mxu0 %v5760_v28  ;;  %2869 = vmatprep.subr.mxu1 %v5760_v28 }
 0x227   : > { %2837 = vmatpush3.msra.mxu0 %v5089_v32  ;;  %2870 = vmatpush3.msra.mxu1 %v4976_v19 }
 0x228   : > { %2838 = vmatprep.subr.mxu0 %v5760_v28  ;;  %2871 = vmatprep.subr.mxu1 %v5760_v28 }
 0x229   : > { %2839 = vmatpush3.msra.mxu0 %v5106_v50  ;;  %2872 = vmatpush3.msra.mxu1 %v4995_v58 }
 0x22a   : > { %2840 = vmatprep.subr.mxu0 %v5760_v28  ;;  %2873 = vmatprep.subr.mxu1 %v5760_v28 }
 0x22b   : > { %2771 = vmatprep.mubr.msk.f32.mxu0 %vm5761_vm0, %v5760_v28  ;;  %2841 = vmatpush3.msra.mxu0 %v5121_v18 }
 0x22c   : > { %2874 = vmatpush3.msra.mxu1 %v5010_v37  ;;  %2772 = vmatmul.mubr.f32.gmra.mxu0 %v1316_v57 }
 0x22d   : > { %2842 = vmatprep.subr.mxu0 %v5760_v28  ;;  %2875 = vmatprep.subr.mxu1 %v5760_v28 }
 0x22e   : > { %2843 = vmatpush3.msra.mxu0 %v5133_v55  ;;  %2876 = vmatpush3.msra.mxu1 %v5026_v5 }
 0x22f   : > { %2844 = vmatprep.subr.mxu0 %v5760_v28  ;;  %2877 = vmatprep.subr.mxu1 %v5760_v28 }
 0x230   : > { %2774 = vmatprep.mubr.msk.f32.mxu0 %vm5761_vm0, %v5760_v28  ;;  %2845 = vmatpush3.msra.mxu0 %v5146_v27 }
 0x231   : > { %2878 = vmatpush3.msra.mxu1 %v5032_v49  ;;  %2775 = vmatmul.mubr.f32.gmra.mxu0 %v1326_v17 }
 0x232   : > { %2846 = vmatprep.subr.mxu0 %v5760_v28  ;;  %2879 = vmatprep.subr.mxu1 %v5760_v28 }
 0x233   : > { %2847 = vmatpush3.msra.mxu0 %v5156_v26  ;;  %2880 = vmatpush3.msra.mxu1 %v5060_v38 }
 0x234   : > { %2812 = vmatprep.mubr.msk.f32.mxu1 %vm5761_vm0, %v5760_v28  ;;  %2848 = vmatprep.subr.mxu0 %v5760_v28 }
 0x235   : > { %2881 = vmatprep.subr.mxu1 %v5760_v28  ;;  %2813 = vmatmul.mubr.f32.gmra.mxu1 %v5205_v9 }
 0x236   : > { %2849 = vmatpush3.msra.mxu0 %v5169_v16  ;;  %2850 = vmatprep.mubr.msk.f32.mxu0 %vm5761_vm0, %v5760_v28 }
 0x237   : > { %2882 = vmatpush3.msra.mxu1 %v5086_v43  ;;  %2851 = vmatmul.mubr.f32.vlgmr.msra.gmra.mxu0 %v5114_v41 }
 0x238   : > { %2883 = vmatprep.subr.mxu1 %v5760_v28  ;;  %2900 = vmatprep.subr.mxu0 %v5760_v28 }
 0x239   : > { %2884 = vmatpush3.msra.mxu1 %v5102_v23  ;;  %2901 = vmatpush3.msra.mxu0 %v1335_v15  ;;  %v2011_v15 = vrot.slane %v2006_v25, 2 }
 0x23a   : > { %2815 = vmatprep.mubr.msk.f32.mxu1 %vm5761_vm0, %v5760_v28  ;;  %2885 = vmatprep.subr.mxu1 %v5760_v28 }
 0x23b   : > { %2902 = vmatprep.subr.mxu0 %v5760_v28  ;;  %2816 = vmatmul.mubr.f32.gmra.mxu1 %v5222_v20 }
 0x23c   : > { %2853 = vmatprep.mubr.msk.f32.mxu0 %vm5761_vm0, %v5760_v28  ;;  %2886 = vmatpush3.msra.mxu1 %v5117_v45 }
 0x23d   : > { %2903 = vmatpush3.msra.mxu0 %v1342_v31  ;;  %2887 = vmatprep.subr.mxu1 %v5760_v28 }
 0x23e   : > { %2854 = vmatmul.mubr.f32.gmra.mxu0 %v5218_v62  ;;  %2904 = vmatprep.subr.mxu0 %v5760_v28 }
 0x23f   : > { %2888 = vmatpush3.msra.mxu1 %v5125_v56  ;;  %2905 = vmatpush3.msra.mxu0 %v1349_v3 }
 0x240   : > { %2889 = vmatprep.subr.mxu1 %v5760_v28  ;;  %2906 = vmatprep.subr.mxu0 %v5760_v28 }
 0x241   : > { %2856 = vmatprep.mubr.msk.f32.mxu0 %vm5761_vm0, %v5760_v28  ;;  %2890 = vmatpush3.msra.mxu1 %v5142_v2 }
 0x242   : > { %2891 = vmatprep.mubr.msk.f32.mxu1 %vm5761_vm0, %v5760_v28  ;;  %2907 = vmatpush3.msra.mxu0 %v1356_v54 }
 0x243   : > { %2857 = vmatmul.mubr.f32.gmra.mxu0 %v5234_v22  ;;  %2892 = vmatmul.mubr.f32.vlgmr.msra.gmra.mxu1 %v1304_v24 }
 0x244   : > { %2908 = vmatprep.subr.mxu0 %v5760_v28  ;;  %2941 = vmatprep.subr.mxu1 %v5760_v28 }
 0x245   : > { %2909 = vmatpush3.msra.mxu0 %v1363_v6  ;;  %2942 = vmatpush3.msra.mxu1 %v4942_v10 }
 0x246   : > { %2910 = vmatprep.subr.mxu0 %v5760_v28  ;;  %2943 = vmatprep.subr.mxu1 %v5760_v28 }
 0x247   : > { %2894 = vmatprep.mubr.msk.f32.mxu1 %vm5761_vm0, %v5760_v28  ;;  %2911 = vmatpush3.msra.mxu0 %v1370_v53 }
 0x248   : > { %2944 = vmatpush3.msra.mxu1 %v4944_v51  ;;  %2912 = vmatprep.subr.mxu0 %v5760_v28 }
 0x249   : > { %2895 = vmatmul.mubr.f32.gmra.mxu1 %v1314_v59  ;;  %2945 = vmatprep.subr.mxu1 %v5760_v28 }
 0x24a   : > { %2913 = vmatpush3.msra.mxu0 %v1377_v14  ;;  %2946 = vmatpush3.msra.mxu1 %v4946_v12 }
 0x24b   : > { %2914 = vmatprep.subr.mxu0 %v5760_v28  ;;  %2947 = vmatprep.subr.mxu1 %v5760_v28 }
 0x24c   : > { %2897 = vmatprep.mubr.msk.f32.mxu1 %vm5761_vm0, %v5760_v28  ;;  %2915 = vmatpush3.msra.mxu0 %v1384_v13 }
 0x24d   : > { %2948 = vmatpush3.msra.mxu1 %v4948_v4  ;;  %2916 = vmatprep.subr.mxu0 %v5760_v28 }
 0x24e   : > { %2898 = vmatmul.mubr.f32.gmra.mxu1 %v1324_v34  ;;  %2949 = vmatprep.subr.mxu1 %v5760_v28 }
 0x24f   : > { %2917 = vmatpush3.msra.mxu0 %v1391_v11  ;;  %2950 = vmatpush3.msra.mxu1 %v4967_v48 }
 0x250   : > { %2918 = vmatprep.subr.mxu0 %v5760_v28  ;;  %2951 = vmatprep.subr.mxu1 %v5760_v28 }
 0x251   : > { %2919 = vmatpush3.msra.mxu0 %v1398_v44  ;;  %2952 = vmatpush3.msra.mxu1 %v4976_v19  ;;  %v2008_v19 = vrot.slane %v2006_v25, 1 }
 0x252   : > { %2920 = vmatprep.subr.mxu0 %v5760_v28  ;;  %2953 = vmatprep.subr.mxu1 %v5760_v28 }
 0x253   : > { %2921 = vmatpush3.msra.mxu0 %v1405_v47  ;;  %2954 = vmatpush3.msra.mxu1 %v4995_v58  ;;  %v2010_v60 = vadd.f32 %v2008_v19, %v2006_v25 }
 0x254   : > { %2922 = vmatprep.subr.mxu0 %v5760_v28  ;;  %2955 = vmatprep.subr.mxu1 %v5760_v28 }
 0x255   : > { %2923 = vmatpush3.msra.mxu0 %v1412_v39  ;;  %2956 = vmatpush3.msra.mxu1 %v5010_v37  ;;  %v2013_v31 = vadd.f32 %v2011_v15, %v2010_v60 }
 0x256   : > { %2924 = vmatprep.subr.mxu0 %v5760_v28  ;;  %2957 = vmatprep.subr.mxu1 %v5760_v28 }
 0x257   : > { %2925 = vmatpush3.msra.mxu0 %v1419_v0  ;;  %2958 = vmatpush3.msra.mxu1 %v5026_v5  ;;  %v2016_v54 = vadd.f32 %v2014_v40, %v2013_v31 }
 0x258   : > { %2926 = vmatprep.subr.mxu0 %v5760_v28  ;;  %2959 = vmatprep.subr.mxu1 %v5760_v28 }
 0x259   : > { %2927 = vmatpush3.msra.mxu0 %v1426_v42  ;;  %2960 = vmatpush3.msra.mxu1 %v5032_v49  ;;  %3056 = vrsqrt.f32 %v2016_v54  ;;  %vm2019_vm5 = vcmp.eq.f32.partialorder %v2016_v54, inf  ;;  %v2022_v41 = vand.u32 2147483648, %v2016_v54  ;;  %vm2021_vm6 = vcmp.eq.f32.partialorder %v2016_v54, 0.0 }
 0x25a   : > { %2928 = vmatprep.subr.mxu0 %v5760_v28  ;;  %2961 = vmatprep.subr.mxu1 %v5760_v28 }
 0x25b   : > { %2929 = vmatpush3.msra.mxu0 %v1433_v21  ;;  %2962 = vmatpush3.msra.mxu1 %v5060_v38 }
 0x25c   : > { %2930 = vmatprep.subr.mxu0 %v5760_v28  ;;  %2963 = vmatprep.subr.mxu1 %v5760_v28 }
 0x25d   : > { %2931 = vmatpush3.msra.mxu0 %v1440_v61  ;;  %2932 = vmatprep.mubr.msk.f32.mxu0 %vm5761_vm0, %v5760_v28 }
 0x25e   : > { %2964 = vmatpush3.msra.mxu1 %v5086_v43  ;;  %2933 = vmatmul.mubr.f32.vlgmr.msra.gmra.mxu0 %v5080_v1 }
 0x25f   : > { %2965 = vmatprep.subr.mxu1 %v5760_v28  ;;  %2935 = vmatprep.mubr.msk.f32.mxu0 %vm5761_vm0, %v5760_v28 }
 0x260   : > { %2966 = vmatpush3.msra.mxu1 %v5102_v23  ;;  %2973 = vmatprep.mubr.msk.f32.mxu1 %vm5761_vm0, %v5760_v28 }
 0x261   : > { %2967 = vmatprep.subr.mxu1 %v5760_v28 }
 0x262   : > { %2968 = vmatpush3.msra.mxu1 %v5117_v45  ;;  %2936 = vmatmul.mubr.f32.gmra.mxu0 %v5205_v9 }
 0x263   : > { %2969 = vmatprep.subr.mxu1 %v5760_v28  ;;  %2938 = vmatprep.mubr.msk.f32.mxu0 %vm5761_vm0, %v5760_v28 }
 0x264   : > { %2970 = vmatpush3.msra.mxu1 %v5125_v56 }
 0x265   : > { %2971 = vmatprep.subr.mxu1 %v5760_v28 }
 0x266   : > { %2972 = vmatpush3.msra.mxu1 %v5142_v2  ;;  %2939 = vmatmul.mubr.f32.gmra.mxu0 %v5222_v20 }
 0x267   : > { %2974 = vmatmul.mubr.f32.vlgmr.msra.gmra.mxu1 %v5080_v1  ;;  %v3057_v1 = vpop.eup %3056 }
 0x268   : > { %2976 = vmatprep.mubr.msk.f32.mxu1 %vm5761_vm0, %v5760_v28  ;;  %v2018_v23 = vmul.f32 %v3057_v1, %v2016_v54 }
 0x26a   : > { %v2020_v45 = vsel %vm2019_vm5, %v2016_v54, %v2018_v23 }
 0x26b   : > { %2977 = vmatmul.mubr.f32.gmra.mxu1 %v5205_v9  ;;  %v2023_v18 = vsel %vm2021_vm6, %v2022_v41, %v2020_v45 }
 0x26c   : > { %2979 = vmatprep.mubr.msk.f32.mxu1 %vm5761_vm0, %v5760_v28  ;;  %3058 = vrcp.f32 %v2023_v18 }
 0x26f   : > { %2980 = vmatmul.mubr.f32.gmra.mxu1 %v5222_v20 }
 0x279   : > { %v3059_v55 = vpop.eup %3058 }
 0x27a   : > { %v2034_v39 = vrot.slane %v3059_v55, 5  ;;  %v2031_v27 = vrot.slane %v3059_v55, 6  ;;  %v2028_v26 = vrot.slane %v3059_v55, 7  ;;  %v2026_v29 = vmul.f32 %v3059_v55, %v2005_v36 }
 0x27c   : > { %v2036_v16 = vmul.f32 %v2034_v39, %v2005_v36  ;;  %v2033_v61 = vmul.f32 %v2031_v27, %v2005_v36  ;;  %v2030_v52 = vmul.f32 %v2028_v26, %v2005_v36 }
 0x27e   : > { %v2038_v59 = vmul.f32 %v2036_v16, %v2036_v16  ;;  %v2050_v34 = vrot.slane %v2036_v16, 3  ;;  %v2061_v57 = vrot.slane %v2033_v61, 2  ;;  %v2081_v17 = vrot.slane %v2030_v52, 1 }
 0x27f   : > { %v2046_v25 = vrot.slane %v2033_v61, 1  ;;  %v2071_v40 = vmul.f32 %v2030_v52, %v2030_v52 }
 0x280   : > { %v2052_v19 = vmul.f32 %v2050_v34, %v2026_v29  ;;  %v2063_v60 = vmul.f32 %v2061_v57, %v2026_v29  ;;  %v2083_v31 = vmul.f32 %v2081_v17, %v2026_v29  ;;  %v5762_v29 = vld [vmem:[#allocation10_spill] sm:$0xff] }
 0x281   : > { %v5763_v34 = vsub.s32 0, %v5762_v29 }
 0x2d4   : > { %v1308_v10 = vpop.f32.mrf.mxu0 }
 0x2d6   : > { %v2770_v51 = vpop.f32.mrf.mxu0 }
 0x2d7   : > { %v2037_v51 = vmul.f32 %v2033_v61, %v2033_v61 }
 0x2db   : > { %v1479_v12 = vpop.f32.mrf.mxu1 }
 0x2dc   : > { %v1480_v4 = vadd.f32 %v1479_v12, %v1308_v10 }
 0x2dd   : > { %v2811_v48 = vpop.f32.mrf.mxu1 }
 0x2ec   : > { %v1318_v35 = vpop.f32.mrf.mxu0 }
 0x2ee   : > { %v2773_v28 = vpop.f32.mrf.mxu0 }
 0x2ef   : > { %v2077_v28 = vrot.slane %v2036_v16, 1 }
 0x2f1   : > { %v1328_v58 = vpop.f32.mrf.mxu0 }
 0x2f3   : > { %v2776_v3 = vpop.f32.mrf.mxu0 }
 0x2f4   : > { %v2094_v3 = vrot.slane %v2037_v51, 1 }
 0x2f5   : > { %v1485_v37 = vpop.f32.mrf.mxu1 }
 0x2f6   : > { %v5423_v6 = vadd.f32 %v1485_v37, %v1318_v35  ;;  %v2058_v35 = vrot.slane %v2036_v16, 2  ;;  %v2048_v37 = vmul.f32 %v2046_v25, %v2030_v52 }
 0x2f7   : > { %v1595_v63 = vpop.f32.mrf.mxu0  ;;  %v2814_v5 = vpop.f32.mrf.mxu1 }
 0x2f8   : > { %v5425_v49 = vadd.f32 %v1595_v63, %v1480_v4  ;;  %v2040_v4 = vrot.slane %v2038_v59, 1  ;;  %v2054_v63 = vrot.slane %v2052_v19, 7  ;;  %v2060_v5 = vmul.f32 %v2058_v35, %v2030_v52 }
 0x2f9   : > { %v2852_v33 = vpop.f32.mrf.mxu0 }
 0x2fa   : > { %v2042_v54 = vadd.f32 %v2040_v4, %v2037_v51  ;;  %v2065_v33 = vrot.slane %v2063_v60, 7  ;;  %v2069_v41 = vadd.f32 %v2054_v63, %v2048_v37  ;;  %v5482_v4 = vld [vmem:[%s357_s17] sm:$0x7] }
 0x2fb   : > { %v1491_v53 = vpop.f32.mrf.mxu1 }
 0x2fc   : > { %v1492_v8 = vadd.f32 %v1491_v53, %v1328_v58  ;;  %v2072_v58 = vrot.slane %v2038_v59, 2  ;;  %v2079_v53 = vmul.f32 %v2077_v28, %v2033_v61  ;;  %v2043_v1 = vmul.f32 2.0, %v2042_v54 }
 0x2fd   : > { %v2817_v30 = vpop.f32.mrf.mxu1  ;;  %v2089_v23 = vsub.f32 %v2060_v5, %v2065_v33  ;;  %v5455_v16 = vmul.f32 2.0, %v2069_v41 }
 0x2fe   : > { %v5427_v38 = vpop.f32.mrf.mxu0  ;;  %v2085_v30 = vrot.slane %v2083_v31, 6 }
 0x2ff   : > { %v1603_v18 = vadd.f32 %v5427_v38, %v5423_v6  ;;  %v5447_v39 = vmul.f32 2.0, %v2089_v23  ;;  %v2154_v51 = vrot.slane %v5455_v16, 4 }
 0x300   : > { %v2855_v14 = vpop.f32.mrf.mxu0  ;;  %v2091_v27 = vadd.f32 %v2085_v30, %v2079_v53 }
 0x301   : > { %v2074_v14 = vadd.f32 %v2072_v58, %v2071_v40  ;;  %v2279_v58 = vrot.slane %v5482_v4, 4 }
 0x302   : > { %v5468_v52 = vmul.f32 2.0, %v2091_v27 }
 0x303   : > { %v1609_v7 = vpop.f32.mrf.mxu0  ;;  %v5429_v13 = vpop.f32.mrf.mxu1  ;;  %v2075_v45 = vmul.f32 2.0, %v2074_v14 }
 0x304   : > { %v1610_v20 = vadd.f32 %v1609_v7, %v1492_v8  ;;  %v2096_v7 = vadd.f32 %v2094_v3, %v2071_v40  ;;  %v2180_v19 = vrot.slane %v5468_v52, 4 }
 0x305   : > { %v2893_v43 = vpop.f32.mrf.mxu1  ;;  %v2858_v32 = vpop.f32.mrf.mxu0  ;;  %v5457_v6 = vsub.f32 1.0, %v2075_v45 }
 0x306   : > { %v2056_v43 = vsub.f32 %v2048_v37, %v2054_v63  ;;  %v2067_v32 = vadd.f32 %v2065_v33, %v2060_v5 }
 0x307   : > { %v2172_v25 = vrot.slane %v5457_v6, 4 }
 0x308   : > { %v5443_v55 = vmul.f32 2.0, %v2056_v43 }
 0x309   : > { %v5431_v11 = vpop.f32.mrf.mxu1 }
 0x30a   : > { %v1707_v26 = vadd.f32 %v5431_v11, %v1603_v18 }
 0x30b   : > { %v2896_v50 = vpop.f32.mrf.mxu1 }
 0x30c   : > { %v2087_v50 = vsub.f32 %v2079_v53, %v2085_v30 }
 0x30e   : > { %v1714_v44 = vpop.f32.mrf.mxu1 }
 0x30f   : > { %v1715_v46 = vadd.f32 %v1714_v44, %v1610_v20  ;;  %v2097_v44 = vmul.f32 2.0, %v2096_v7  ;;  %v2117_v20 = vrot.slane %v5443_v55, 1 }
 0x310   : > { %v2899_v56 = vpop.f32.mrf.mxu1 }
 0x311   : > { %v2044_v56 = vsub.f32 1.0, %v2043_v1  ;;  %v2098_v38 = vsub.f32 1.0, %v2097_v44 }
 0x313   : > { %v5478_v17 = vrot.slane %v2098_v38, 7 }
 0x31e   : > { %v5433_v47 = vpop.f32.mrf.mxu0 }
 0x320   : > { %v2934_v24 = vpop.f32.mrf.mxu0 }
 0x321   : > { %v5445_v24 = vmul.f32 2.0, %v2067_v32 }
 0x322   : > { %v5435_v2 = vpop.f32.mrf.mxu0 }
 0x323   : > { %v1840_v8 = vadd.f32 %v5435_v2, %v1707_v26  ;;  %v2131_v59 = vrot.slane %v5445_v24, 1  ;;  %v2187_v35 = vrot.slane %v5445_v24, 5 }
 0x324   : > { %v2937_v0 = vpop.f32.mrf.mxu0 }
 0x325   : > { %v1699_v0 = vadd.f32 %v5429_v13, %v5425_v49  ;;  %v5466_v13 = vrot.slane %v2044_v56, 2 }
 0x326   : > { %v1845_v42 = vpop.f32.mrf.mxu0 }
 0x327   : > { %v5437_v21 = vpop.f32.mrf.mxu1  ;;  %v1846_v12 = vadd.f32 %v1845_v42, %v1715_v46  ;;  %v5452_v42 = vmul.f32 2.0, %v2087_v50  ;;  %v1834_v61 = vadd.f32 %v5433_v47, %v1699_v0 }
 0x328   : > { %v2940_v9 = vpop.f32.mrf.mxu0 }
 0x329   : > { %v2975_v62 = vpop.f32.mrf.mxu1  ;;  %v3062_v9 = vld [vmem:[%s3313_s10] sm:$0xf]  ;;  %v1933_v47 = vadd.f32 %v5437_v21, %v1834_v61  ;;  %v2135_v46 = vrot.slane %v5452_v42, 1  ;;  %v2190_v60 = vrot.slane %v5452_v42, 5  ;;  %s2606_s10 = sshll.u32 %s5421_s25, 2 }
 0x32a   : > { %v1971_v49 = vrot.slane %v3062_v9, 4  ;;  %v2109_v62 = vrot.slane %v5447_v39, 7  ;;  %s5544_s18 = scalar_lea.vmem [#allocation3], %s2606_s10  ;;  %s5602_s20 = scalar_lea.vmem [#allocation6], %s2606_s10 }
 0x32b   : > { %v5439_v22 = vpop.f32.mrf.mxu1 }
 0x32c   : > { %v1939_v2 = vadd.f32 %v5439_v22, %v1840_v8  ;;  %v2168_v22 = vrot.slane %v5443_v55, 5 }
 0x32d   : > { %v2978_v10 = vpop.f32.mrf.mxu1 }
 0x32e   : > { %v2150_v10 = vrot.slane %v2044_v56, 6 }
 0x32f   : > { %v1944_v48 = vpop.f32.mrf.mxu1 }
 0x330   : > { %v1945_v15 = vadd.f32 %v1944_v48, %v1846_v12  ;;  %v2161_v12 = vrot.slane %v5447_v39, 3 }
 0x331   : > { %v2981_v36 = vpop.f32.mrf.mxu1 }
 0x332   : > { %3060 = vrcp.f32 %v1945_v15  ;;  %v5493_v15 = vrot.slane %v2098_v38, 3 }
 0x33f   : > { %v3061_v11 = vpop.eup %3060 }
 0x340   : > { %v1953_v57 = vrot.slane %v3061_v11, %v5763_v34 }
 0x342   : > { %v5484_v48 = vmul.f32 %v1953_v57, %v1933_v47  ;;  %v5486_v21 = vmul.f32 %v1953_v57, %v1939_v2 }
 0x344   : > { %1956 = vst [vmem:[%s5497_s24] sm:$0xff] %v5484_v48  ;;  %1957 = vst [vmem:[%s5497_s24 + $0x8] sm:$0xff] %v5486_v21  ;;  %v1958_v28 = vmul.f32 %v3062_v9, %v5484_v48  ;;  %v1973_v31 = vmul.f32 %v1971_v49, %v5484_v48  ;;  %v1982_v40 = vmul.f32 %v3062_v9, %v5486_v21  ;;  %v1967_v3 = vrot.slane %v5484_v48, 3 }
 0x345   : > { %v1991_v36 = vrot.slane %v5486_v21, 3  ;;  %v2103_v54 = vmul.f32 %v5455_v16, %v5484_v48  ;;  %v2111_v37 = vmul.f32 %v2109_v62, %v5484_v48  ;;  %v2102_v53 = vmul.f32 %v5466_v13, %v5484_v48 }
 0x346   : > { %v1960_v63 = vrot.slane %v1958_v28, 1  ;;  %v1963_v5 = vrot.slane %v1958_v28, 2  ;;  %v1975_v33 = vrot.slane %v1973_v31, 1  ;;  %v1978_v30 = vrot.slane %v1973_v31, 2 }
 0x347   : > { %v1984_v14 = vrot.slane %v1982_v40, 1  ;;  %v1987_v7 = vrot.slane %v1982_v40, 2  ;;  %v2105_v1 = vrot.slane %v2103_v54, 1  ;;  %v2113_v23 = vrot.slane %v2111_v37, 2 }
 0x348   : > { %v1962_v43 = vadd.f32 %v1960_v63, %v1958_v28  ;;  %v1977_v32 = vadd.f32 %v1975_v33, %v1973_v31  ;;  %v2120_v50 = vmul.f32 %v5457_v6, %v5484_v48  ;;  %v2119_v44 = vmul.f32 %v2117_v20, %v5484_v48 }
 0x349   : > { %v1986_v41 = vadd.f32 %v1984_v14, %v1982_v40  ;;  %v2107_v45 = vadd.f32 %v2105_v1, %v2102_v53  ;;  %v2125_v18 = vmul.f32 %v5468_v52, %v5484_v48  ;;  %v2137_v26 = vmul.f32 %v2135_v46, %v5484_v48 }
 0x34a   : > { %v1965_v56 = vadd.f32 %v1963_v5, %v1962_v43  ;;  %v1980_v27 = vadd.f32 %v1978_v30, %v1977_v32  ;;  %v2122_v0 = vrot.slane %v2120_v50, 1  ;;  %v2133_v8 = vmul.f32 %v2131_v59, %v5484_v48 }
 0x34b   : > { %v1989_v38 = vadd.f32 %v1987_v7, %v1986_v41  ;;  %v5526_v61 = vadd.f32 %v2113_v23, %v2107_v45  ;;  %v2145_v9 = vmul.f32 %v5478_v17, %v5484_v48  ;;  %v2127_v47 = vrot.slane %v2125_v18, 2 }
 0x34c   : > { %v1981_v49 = vadd.f32 %v1980_v27, %v1967_v3  ;;  %v2124_v11 = vadd.f32 %v2122_v0, %v2119_v44  ;;  %v2139_v2 = vrot.slane %v2137_v26, 1  ;;  %v1969_v29 = vadd.f32 %v1967_v3, %v1965_v56 }
 0x34d   : > { %v1993_v34 = vadd.f32 %v1991_v36, %v1989_v38  ;;  %v2147_v57 = vrot.slane %v2145_v9, 2  ;;  %v2156_v28 = vmul.f32 %v2154_v51, %v5484_v48  ;;  %v2152_v54 = vmul.f32 %v2150_v10, %v5484_v48 }
 0x34e   : > { %v1995_v31 = vrot.slane %v1981_v49, 3  ;;  %v2141_v40 = vadd.f32 %v2139_v2, %v2133_v8  ;;  %v2163_v37 = vmul.f32 %v2161_v12, %v5484_v48  ;;  %v2129_v5 = vadd.f32 %v2127_v47, %v2124_v11 }
 0x34f   : > { %v1998_v63 = vrot.slane %v1993_v34, 6  ;;  %v2158_v33 = vrot.slane %v2156_v28, 1  ;;  %v2174_v53 = vmul.f32 %v2172_v25, %v5484_v48  ;;  %v2170_v36 = vmul.f32 %v2168_v22, %v5484_v48 }
 0x350   : > { %v2001_v30 = vsel %vm2000_vm1, %v1969_v29, %v1995_v31  ;;  %v2149_v3 = vadd.f32 %v2147_v57, %v2141_v40  ;;  %v2182_v51 = vmul.f32 %v2180_v19, %v5484_v48  ;;  %v2165_v10 = vrot.slane %v2163_v37, 2 }
 0x351   : > { %v2003_v14 = vsel %vm2002_vm2, %v2001_v30, %v1998_v63  ;;  %v2160_v7 = vadd.f32 %v2158_v33, %v2152_v54  ;;  %v2176_v1 = vrot.slane %v2174_v53, 1  ;;  %v2189_v25 = vmul.f32 %v2187_v35, %v5484_v48 }
 0x352   : > { %2004 = vst [vmem:[%s5544_s18] sm:$0x7] %v2003_v14  ;;  %v2184_v12 = vrot.slane %v2182_v51, 2  ;;  %v2192_v22 = vmul.f32 %v2190_v60, %v5484_v48  ;;  %v2199_v19 = vmul.f32 %v5493_v15, %v5484_v48  ;;  %v2204_v32 = vmul.f32 %v5466_v13, %v5486_v21 }
 0x353   : > { %v2167_v43 = vadd.f32 %v2165_v10, %v2160_v7  ;;  %v2205_v23 = vmul.f32 %v5455_v16, %v5486_v21  ;;  %v2210_v50 = vmul.f32 %v2109_v62, %v5486_v21  ;;  %v2178_v35 = vadd.f32 %v2176_v1, %v2170_v36 }
 0x354   : > { %v2194_v41 = vrot.slane %v2192_v22, 1  ;;  %v2201_v45 = vrot.slane %v2199_v19, 2  ;;  %v2216_v60 = vmul.f32 %v5457_v6, %v5486_v21  ;;  %v2215_v13 = vmul.f32 %v2117_v20, %v5486_v21 }
 0x355   : > { %v2207_v15 = vrot.slane %v2205_v23, 1  ;;  %v2212_v44 = vrot.slane %v2210_v50, 2  ;;  %v2221_v16 = vmul.f32 %v5468_v52, %v5486_v21  ;;  %v2226_v62 = vmul.f32 %v2131_v59, %v5486_v21 }
 0x356   : > { %v2196_v18 = vadd.f32 %v2194_v41, %v2189_v25  ;;  %v2218_v39 = vrot.slane %v2216_v60, 1  ;;  %v2227_v6 = vmul.f32 %v2135_v46, %v5486_v21  ;;  %v2232_v0 = vmul.f32 %v5478_v17, %v5486_v21  ;;  %v2361_v25 = vld [vmem:[%s5497_s24 + $0x8] sm:$0xff] (%p3245_p5) }
 0x357   : > { %v2209_v56 = vadd.f32 %v2207_v15, %v2204_v32  ;;  %v2223_v27 = vrot.slane %v2221_v16, 2  ;;  %v2238_v55 = vrot.slane %v2129_v5, 7  ;;  %v2241_v52 = vrot.slane %v2149_v3, 6  ;;  %2362 = vst [vmem:[%s2328_s13 + $0x10] sm:$0xff] (%p3245_p5), %v2361_v25 }
 0x358   : > { %v2203_v20 = vadd.f32 %v2201_v45, %v2196_v18  ;;  %v2220_v26 = vadd.f32 %v2218_v39, %v2215_v13  ;;  %v2229_v38 = vrot.slane %v2227_v6, 1  ;;  %v2186_v8 = vadd.f32 %v2184_v12, %v2178_v35  ;;  %v2359_v12 = vld [vmem:[%s5497_s24] sm:$0xff] (%p3245_p5) }
 0x359   : > { %v2214_v9 = vadd.f32 %v2212_v44, %v2209_v56  ;;  %v2244_v49 = vrot.slane %v2167_v43, 1  ;;  %v2255_v24 = vsel %vm2000_vm1, %v5526_v61, %v2238_v55  ;;  %v2234_v42 = vrot.slane %v2232_v0, 2  ;;  %2360 = vst [vmem:[%s2328_s13] sm:$0xff] (%p3245_p5), %v2359_v12 }
 0x35a   : > { %v2225_v59 = vadd.f32 %v2223_v27, %v2220_v26  ;;  %v2231_v11 = vadd.f32 %v2229_v38, %v2226_v62  ;;  %v2256_v46 = vsel %vm2002_vm2, %v2255_v24, %v2241_v52  ;;  %v2247_v47 = vrot.slane %v2203_v20, 7 }
 0x35b   : > { %v2258_v17 = vsel %vm2257_vm4, %v2256_v46, %v2244_v49  ;;  %v2270_v2 = vmul.f32 %v5482_v4, %v5484_v48  ;;  %v2281_v29 = vmul.f32 %v2279_v58, %v5484_v48  ;;  %v2250_v57 = vrot.slane %v2214_v9, 2 }
 0x35c   : > { %v2236_v34 = vadd.f32 %v2234_v42, %v2231_v11  ;;  %v2260_v61 = vsel %vm2259_vm7, %v2258_v17, %v2186_v8  ;;  %v2289_v28 = vmul.f32 %v5482_v4, %v5486_v21  ;;  %v2253_v31 = vrot.slane %v2225_v59, 1 }
 0x35d   : > { %v2262_v40 = vsel %vm2261_vm8, %v2260_v61, %v2247_v47  ;;  %v2272_v54 = vrot.slane %v2270_v2, 1  ;;  %v2283_v37 = vrot.slane %v2281_v29, 1  ;;  %v2286_v21 = vrot.slane %v2281_v29, 2 }
 0x35e   : > { %v2264_v63 = vsel %vm2263_vm9, %v2262_v40, %v2250_v57  ;;  %2268 = vst [vmem:[%s5593_s19 + $0x8] sm:$0x1] %v2236_v34  ;;  %v2291_v48 = vrot.slane %v2289_v28, 1  ;;  %v2294_v53 = vrot.slane %v2289_v28, 2  ;;  %v2275_v30 = vrot.slane %v2270_v2, 2 }
 0x35f   : > { %v2266_v58 = vsel %vm2265_vm10, %v2264_v63, %v2253_v31  ;;  %v2274_v5 = vadd.f32 %v2272_v54, %v2270_v2  ;;  %v2285_v4 = vadd.f32 %v2283_v37, %v2281_v29 }
 0x360   : > { %2267 = vst [vmem:[%s5593_s19] sm:$0xff] %v2266_v58  ;;  %v2293_v33 = vadd.f32 %v2291_v48, %v2289_v28 }
 0x361   : > { %v2288_v3 = vadd.f32 %v2286_v21, %v2285_v4  ;;  %v2277_v51 = vadd.f32 %v2275_v30, %v2274_v5 }
 0x362   : > { %v2296_v36 = vadd.f32 %v2294_v53, %v2293_v33 }
 0x363   : > { %v2298_v14 = vrot.slane %v2288_v3, 3  ;;  %2326 = sbr.rel (!%p3245_p5) target bundleno = 872 (0x368), region = 44 }
 0x364   : > { %v2301_v7 = vrot.slane %v2296_v36, 6 }
 0x365   : > { %v2303_v10 = vsel %vm2000_vm1, %v2277_v51, %v2298_v14 }
 0x366   : > { %v2304_v1 = vsel %vm2002_vm2, %v2303_v10, %v2301_v7 }
 0x367   : > { %2305 = vst [vmem:[%s5602_s20] sm:$0x7] %v2304_v1 }
 0x368 PF: > { %s5724_s17 = sshll.u32 %s3228_s9, 6  ;;  %s2375_s10 = sshll.u32 %s5544_s18, 4  ;;  %s2376_s10 = int_to_ptr.vmem [resolvable:$true] %s2375_s10 }
 0x369   : > { %s2373_s0 = scalar_lea.hbm %s5687_s6, %s5724_s17  ;;  %s3063_s24 = scalar_lea.vmem %s2376_s10, 64 }
 0x36a   : > { %p3064_p11 = scmp.ne.s32.totalorder %s2376_s10, %s3063_s24  ;;  %s3160_s23 = smov [#allocation3]  }
 0x36b   : > { %s3067_s26 = sshll.u32 %s3160_s23, 4  ;;  %s3068_s26 = int_to_ptr.vmem [resolvable:$false] %s3067_s26 }
 0x36c   : > { %p3065_p12 = pnand %p3064_p11, %p3245_p5  ;;  %s3069_s12 = scalar_lea.vmem %s3068_s26, 128 }
 0x36d   : > { %p3070_p0 = scmp.lt.s32.totalorder %s2376_s10, %s3068_s26  ;;  %p3071_p1 = scmp.lt.s32.totalorder %s3069_s12, %s3063_s24 }
 0x36e   : > { %p3066_p13 = pneg %p3065_p12 }
 0x36f   : > { %p3072_p2 = por %p3071_p1, %p3070_p0 }
 0x371   : > { %p3073_p3 = pnand %p3072_p2, %p3066_p13 }
 0x373   : > { %3076 = shalt.err (!%p3073_p3)
}
 0x374   : > { %s3077_s18 = scalar_lea.hbm %s2373_s0, 64  ;;  %s3081_s13 = scalar_lea.hbm %s5687_s6, 128 }
 0x375   : > { %p3078_p4 = scmp.ne.s32.totalorder %s2373_s0, %s3077_s18  ;;  %p3082_p9 = scmp.lt.s32.totalorder %s2373_s0, %s5687_s6 }
 0x376   : > { %p3083_p10 = scmp.lt.s32.totalorder %s3081_s13, %s3077_s18 }
 0x377   : > { %p3079_p7 = pnand %p3078_p4, %p3245_p5 }
 0x378   : > { %p3084_p11 = por %p3083_p10, %p3082_p9 }
 0x379   : > { %p3080_p8 = pneg %p3079_p7 }
 0x37b   : > { %p3085_p12 = pnand %p3084_p11, %p3080_p8 }
 0x37d   : > { %3088 = shalt.err (!%p3085_p12)
}
 0x37e   : > { %s5764_s24 = scalar_lea.sflag [#allocation4], %s5421_s25  ;;  %2381 = sbr.rel (!%p3245_p5) target bundleno = 899 (0x383), region = 86  ;;  %v2414_v22 = vld [vmem:[%s5593_s19] sm:$0xff] (%p3245_p5)  ;;  %v2416_v19 = vld [vmem:[%s5593_s19 + $0x8] sm:$0xff] (%p3245_p5) }
 0x37f   : > { %2982 = dma.vmem_to_hbm [thread:$0]  (%p3245_p5), %s2376_s10, 64, %s2373_s0, %s5764_s24  }
 0x380   : > { %s2618_s23 = sshll.u32 (%p3245_p5), %s3228_s9, 3 }
 0x381   : > { %s2383_s26 = scalar_lea.vmem (%p3245_p5), %s5688_s7, %s2618_s23 }
 0x382   : > { %2415 = vst [vmem:[%s2383_s26] sm:$0xff] (%p3245_p5), %v2414_v22  ;;  %2417 = vst [vmem:[%s2383_s26 + $0x10] sm:$0xff] (%p3245_p5), %v2416_v19 }
 0x383 PF: > { %s5765_s12 = sshll.u32 %s3228_s9, 6  ;;  %s2430_s21 = sshll.u32 %s5602_s20, 4  ;;  %s2431_s21 = int_to_ptr.vmem [resolvable:$true] %s2430_s21 }
 0x384   : > { %s2428_s10 = scalar_lea.hbm %s5689_s8, %s5765_s12  ;;  %s3089_s22 = scalar_lea.vmem %s2431_s21, 64 }
 0x385   : > { %p3090_p13 = scmp.ne.s32.totalorder %s2431_s21, %s3089_s22  ;;  %s3161_s19 = smov [#allocation6]  }
 0x386   : > { %s3093_s13 = sshll.u32 %s3161_s19, 4  ;;  %s3094_s13 = int_to_ptr.vmem [resolvable:$false] %s3093_s13 }
 0x387   : > { %p3091_p0 = pnand %p3090_p13, %p3245_p5  ;;  %s3095_s24 = scalar_lea.vmem %s3094_s13, 128 }
 0x388   : > { %p3096_p2 = scmp.lt.s32.totalorder %s2431_s21, %s3094_s13  ;;  %p3097_p3 = scmp.lt.s32.totalorder %s3095_s24, %s3089_s22 }
 0x389   : > { %p3092_p1 = pneg %p3091_p0 }
 0x38a   : > { %p3098_p4 = por %p3097_p3, %p3096_p2 }
 0x38c   : > { %p3099_p7 = pnand %p3098_p4, %p3092_p1 }
 0x38e   : > { %3102 = shalt.err (!%p3099_p7)
}
 0x38f   : > { %s3103_s9 = scalar_lea.hbm %s2428_s10, 64  ;;  %s3107_s1 = scalar_lea.hbm %s5689_s8, 128 }
 0x390   : > { %p3104_p8 = scmp.ne.s32.totalorder %s2428_s10, %s3103_s9  ;;  %p3108_p11 = scmp.lt.s32.totalorder %s2428_s10, %s5689_s8 }
 0x391   : > { %p3109_p12 = scmp.lt.s32.totalorder %s3107_s1, %s3103_s9 }
 0x392   : > { %p3105_p9 = pnand %p3104_p8, %p3245_p5 }
 0x393   : > { %p3110_p13 = por %p3109_p12, %p3108_p11 }
 0x394   : > { %p3106_p10 = pneg %p3105_p9 }
 0x396   : > { %p3111_p0 = pnand %p3110_p13, %p3106_p10 }
 0x398   : > { %3114 = shalt.err (!%p3111_p0)
}
 0x399   : > { %s5766_s12 = scalar_lea.sflag [#allocation7], %s5421_s25 }
 0x39a   : > { %2983 = dma.vmem_to_hbm [thread:$0]  (%p3245_p5), %s2431_s21, 64, %s2428_s10, %s5766_s12  }
 0x39b PF: > { %p2993_p1 = scmp.ge.s32.totalorder %s3153_s30, 2  ;;  %s2449_s18 = sand.u32 1, %s3141_s27  }
 0x39c   : > { %s2450_s0 = scalar_lea.sflag [#allocation4], %s2449_s18 }
 0x39d   : > { %p2987_p2 = pnand %p2993_p1, %p3249_p6 }
 0x39f   : > { %p2988_p3 = pneg %p2987_p2 }
 0x3a1   : > { %3132 = dma.done.wait (%p2988_p3), %s2450_s0, 64  }
 0x3a2   : > { %3134 = vsyncadd (%p2988_p3), %s2450_s0, 4294967232  ;;  %s2466_s22 = scalar_lea.sflag [#allocation7], %s2449_s18 }
 0x3a3   : > { %3136 = dma.done.wait (%p2988_p3), %s2466_s22, 64  }
 0x3a4   : > { %3138 = vsyncadd (%p2988_p3), %s2466_s22, 4294967232  ;;  %p22_p5 = scmp.ge.s32.totalorder %s3232_s11, 4   ;;  %s5767_s27 = smov %s3145_s28 }
 0x3a5   : > { %s5768_s28 = smov %s3149_s29  ;;  %s5769_s29 = smov %s3243_s14 }
 0x3a6   : > { %s5770_s30 = smov %s3232_s11  ;;  %24 = sbr.rel (!%p22_p5) target bundleno = 8 (0x8), region = 198 }
 0x3ab   :  { %2471 = vsyncpa [#allocation4], 1 }
 0x3ac   :  { %2473 = vsyncpa [#allocation4 + $0x1], 1 }
 0x3ad   :  { %2474 = vsyncpa [#allocation7], 1 }
 0x3ae   :  { %2476 = vsyncpa [#allocation7 + $0x1], 1 }

</bundles_post_ra>
